<compile_context>
chip_gen: v7x
topology: tpu7x:2x2x1
jax: 0.10.0
libtpu: 0.0.40
codegen_flags: <defaults>
</compile_context>

<pallas_src>
import functools
import math

import jax
import jax.numpy as jnp
from jax.experimental import pallas as pl
from jax.experimental.pallas import tpu as pltpu


# ----------------------------------------------------------------------------- config
class Config:
    vocab_size = 100
    type_vocab_size = 2
    hidden_size = 32
    num_attention_heads = 2
    intermediate_size = 64
    num_hidden_layers = 2
    max_position_embeddings = 32
    layer_norm_eps = 1e-12


# ----------------------------------------------------------------------------- helpers
def _ln(v, gamma, beta, eps):
    mu = jnp.mean(v, axis=-1, keepdims=True)
    var = jnp.mean((v - mu) ** 2, axis=-1, keepdims=True)
    return (v - mu) * jax.lax.rsqrt(var + eps) * gamma + beta


def _gelu_tanh(x):
    # TODO(synk): ttnn.gelu may use the exact erf form; tanh approximation used here.
    c = math.sqrt(2.0 / math.pi)
    return 0.5 * x * (1.0 + jnp.tanh(c * (x + 0.044715 * x * x * x)))


# ----------------------------------------------------------------------------- fused kernel
def fused_bert_kernel(*refs, B, S, H, inter, num_heads, num_layers, eps,
                      use_mask, use_type, pos_off, type_off):
    idx_ref = refs[0]
    off = 1
    mask_ref = None
    if use_mask:
        mask_ref = refs[off]
        off += 1
    emb_ref, w_ref, wf_ref, vec_ref, o_ref = refs[off:]

    f32, bf16 = jnp.float32, jnp.bfloat16
    BS = B * S
    dh = H // num_heads
    scale = 1.0 / math.sqrt(dh)
    T = emb_ref.shape[0]                       # padded embedding-table rows

    # --- fused embedding lookup: one multi-hot matmul against the packed table.
    #     Row r of `hot` has a 1 at word_id[r] and at pos_off + pos_id[r]
    #     (+ type_off + type_id[r]); hot @ table == sum of the gathered rows.
    idx = idx_ref[...]                                            # (BS, 2|3) int32
    colid = jax.lax.broadcasted_iota(jnp.int32, (BS, T), 1)
    sel = (colid == idx[:, 0:1]) | (colid == idx[:, 1:2] + pos_off)
    if use_type:
        sel = sel | (colid == idx[:, 2:3] + type_off)
    hot = jnp.where(sel, 1.0, 0.0).astype(bf16)
    emb = jnp.dot(hot, emb_ref[...], preferred_element_type=f32)  # (BS, H) f32

    # All bias / LayerNorm vectors, loaded & cast once.
    vec_all = vec_ref[...].astype(f32)                            # (L, 8, 4H)

    # Embedding LayerNorm (gamma/beta packed in layer-0 row 3).
    x = _ln(emb, vec_all[0, 3:4, 0:H], vec_all[0, 3:4, H:2 * H], eps)

    # --- additive attention-score mask, hoisted out of the layer loop:
    #     block-diagonal over the collapsed batch (float-floor batch ids, no
    #     vector integer division) + optional user padding mask over keys.
    ri = jax.lax.broadcasted_iota(jnp.int32, (BS, BS), 0).astype(f32)
    ci = jax.lax.broadcasted_iota(jnp.int32, (BS, BS), 1).astype(f32)
    rblk = jnp.floor((ri + 0.5) * (1.0 / S))
    cblk = jnp.floor((ci + 0.5) * (1.0 / S))
    amask = jnp.where(rblk == cblk, 0.0, -1e9)
    if use_mask:
        amask = amask + (1.0 - mask_ref[...].astype(f32)) * -10000.0  # (1,BS) bcast

    for l in range(num_layers):                 # static unroll (L=2)
        Wl = w_ref[l]                           # (H, 3H+H+I) bf16: [wq|wk|wv|wo|wi]
        vl = vec_all[l]                         # (8, 4H) f32
        bqkv = vl[0:1, 0:3 * H]
        bo = vl[0:1, 3 * H:4 * H]
        bi = vl[1:2, 0:inter]
        bff = vl[1:2, inter:inter + H]
        g1, b1 = vl[2:3, 0:H], vl[2:3, H:2 * H]
        g2, b2 = vl[2:3, 2 * H:3 * H], vl[2:3, 3 * H:4 * H]

        xb = x.astype(bf16)
        # Fused QKV projection: single (BS, H) @ (H, 3H) matmul + one bias add.
        qkv = (jnp.dot(xb, Wl[:, 0:3 * H], preferred_element_type=f32)
               + bqkv).astype(bf16)

        # Per-head attention; output projection accumulated per head
        # (no cross-lane concat of the per-head context blocks).
        attn = jnp.zeros((BS, H), f32)
        for h in range(num_heads):              # static unroll (nh=2)
            lo, hi = h * dh, (h + 1) * dh
            qh = qkv[:, lo:hi]
            kh = qkv[:, H + lo:H + hi]
            vh = qkv[:, 2 * H + lo:2 * H + hi]
            s = jax.lax.dot_general(qh, kh, (((1,), (1,)), ((), ())),
                                    preferred_element_type=f32) * scale + amask
            s = s - jnp.max(s, axis=-1, keepdims=True)
            p = jnp.exp(s)
            p = p * pl.reciprocal(jnp.sum(p, axis=-1, keepdims=True), approx=True)
            ctx = jnp.dot(p.astype(bf16), vh, preferred_element_type=f32)   # (BS,dh)
            attn = attn + jnp.dot(ctx.astype(bf16), Wl[lo:hi, 3 * H:4 * H],
                                  preferred_element_type=f32)
        attn = attn + bo

        h1 = _ln(x + attn, g1, b1, eps)
        ff = _gelu_tanh(jnp.dot(h1.astype(bf16), Wl[:, 4 * H:4 * H + inter],
                                preferred_element_type=f32) + bi)
        ff = jnp.dot(ff.astype(bf16), wf_ref[l], preferred_element_type=f32) + bff
        x = _ln(h1 + ff, g2, b2, eps)

    # Single store at the very end.
    o_ref[...] = x.astype(o_ref.dtype)


def bert_fused(idx2d, mask2d, packed, cfg, B, S, use_type):
    H = cfg.hidden_size
    BS = B * S
    use_mask = mask2d is not None

    def full_spec(shape):
        n = len(shape)

        def imap(i):
            return (0,) * n

        return pl.BlockSpec(shape, imap)

    args = [idx2d]
    in_specs = [full_spec(idx2d.shape)]
    if use_mask:
        args.append(mask2d)
        in_specs.append(full_spec(mask2d.shape))
    for name in ("emb_table", "w_slab", "wf_slab", "vec_slab"):
        a = packed[name]
        args.append(a)
        in_specs.append(full_spec(a.shape))

    kernel = functools.partial(
        fused_bert_kernel,
        B=B, S=S, H=H, inter=cfg.intermediate_size,
        num_heads=cfg.num_attention_heads,
        num_layers=cfg.num_hidden_layers,
        eps=cfg.layer_norm_eps,
        use_mask=use_mask, use_type=use_type,
        pos_off=packed["pos_off"], type_off=packed["type_off"])

    return pl.pallas_call(
        kernel,
        out_shape=jax.ShapeDtypeStruct((BS, H), jnp.bfloat16),
        grid_spec=pltpu.PrefetchScalarGridSpec(
            num_scalar_prefetch=0,
            grid=(1,),
            in_specs=in_specs,
            out_specs=full_spec((BS, H)),
        ),
        compiler_params=pltpu.CompilerParams(
            dimension_semantics=("arbitrary",)),
    )(*args)


# ----------------------------------------------------------------------------- params
def init_params(cfg, key):
    H, I, L = cfg.hidden_size, cfg.intermediate_size, cfg.num_hidden_layers
    dt = jnp.bfloat16

    def nrm(k, shape, scale=0.02):
        return (scale * jax.random.normal(k, shape, dtype=jnp.float32)).astype(dt)

    keys = iter(jax.random.split(key, 32))
    params = {
        "word_emb": nrm(next(keys), (cfg.vocab_size, H)),
        "token_type_emb": nrm(next(keys), (cfg.type_vocab_size, H)),
        "pos_emb": nrm(next(keys), (cfg.max_position_embeddings, H)),
        "emb_ln_g": jnp.ones((1, H), dt),
        "emb_ln_b": jnp.zeros((1, H), dt),
        # per-layer weights stacked on a leading (L,) axis, pre-transposed to
        # (in_features, out_features) so the kernel computes y = x @ W + b.
        "wq": nrm(next(keys), (L, H, H)), "bq": jnp.zeros((L, 1, H), dt),
        "wk": nrm(next(keys), (L, H, H)), "bk": jnp.zeros((L, 1, H), dt),
        "wv": nrm(next(keys), (L, H, H)), "bv": jnp.zeros((L, 1, H), dt),
        "wo": nrm(next(keys), (L, H, H)), "bo": jnp.zeros((L, 1, H), dt),
        "ln1_g": jnp.ones((L, 1, H), dt), "ln1_b": jnp.zeros((L, 1, H), dt),
        "wi": nrm(next(keys), (L, H, I)), "bi": jnp.zeros((L, 1, I), dt),
        "wf": nrm(next(keys), (L, I, H)), "bf": jnp.zeros((L, 1, H), dt),
        "ln2_g": jnp.ones((L, 1, H), dt), "ln2_b": jnp.zeros((L, 1, H), dt),
    }
    return params


def pack_params(p, cfg):
    """One-time packing of the logical params into a few lane-dense slabs."""
    H, I, L = cfg.hidden_size, cfg.intermediate_size, cfg.num_hidden_layers
    dt = jnp.bfloat16

    # Embedding table: [word | pos | type] rows, zero-padded to a multiple of 8.
    word, pos, typ = p["word_emb"], p["pos_emb"], p["token_type_emb"]
    pos_off = word.shape[0]
    type_off = pos_off + pos.shape[0]
    rows = type_off + typ.shape[0]
    pad_rows = (-rows) % 8
    emb_table = jnp.concatenate(
        [word, pos, typ, jnp.zeros((pad_rows, H), dt)], axis=0)

    # Hidden-side matrices, lane-concatenated: [wq|wk|wv|wo|wi] -> (L, H, 4H+I).
    w_slab = jnp.concatenate([p["wq"], p["wk"], p["wv"], p["wo"], p["wi"]], axis=-1)
    wf_slab = p["wf"]                                              # (L, I, H)

    # All per-layer vectors in one (L, 8, 4H) slab (4H = 128 lanes for bert_tiny):
    #   row 0: [bq|bk|bv|bo]      row 1: [bi|bf|0]
    #   row 2: [ln1_g|ln1_b|ln2_g|ln2_b]
    #   row 3 (layer 0 only): [emb_ln_g|emb_ln_b|0]
    VW = 4 * H
    assert I + H <= VW
    row0 = jnp.concatenate([p["bq"], p["bk"], p["bv"], p["bo"]], axis=-1)
    row1 = jnp.concatenate([p["bi"], p["bf"],
                            jnp.zeros((L, 1, VW - I - H), dt)], axis=-1)
    row2 = jnp.concatenate([p["ln1_g"], p["ln1_b"], p["ln2_g"], p["ln2_b"]], axis=-1)
    emb_row = jnp.concatenate([p["emb_ln_g"], p["emb_ln_b"],
                               jnp.zeros((1, VW - 2 * H), dt)], axis=-1)[None]
    row3 = jnp.concatenate([emb_row, jnp.zeros((L - 1, 1, VW), dt)], axis=0)
    vec_slab = jnp.concatenate([row0, row1, row2, row3,
                                jnp.zeros((L, 4, VW), dt)], axis=1)   # (L, 8, VW)

    return dict(emb_table=emb_table, w_slab=w_slab, wf_slab=wf_slab,
                vec_slab=vec_slab, pos_off=int(pos_off), type_off=int(type_off))


# ----------------------------------------------------------------------------- forward
def tt_bert_forward(packed, cfg, input_ids, attention_mask=None,
                    token_type_ids=None, position_ids=None,
                    past_key_values_length=0):
    B, S = input_ids.shape
    H = cfg.hidden_size
    BS = B * S

    if position_ids is None:
        pos = jnp.arange(past_key_values_length, past_key_values_length + S,
                         dtype=jnp.int32)
        pos_flat = jnp.tile(pos, B)                      # constant-folds under jit
    else:
        pos_flat = jnp.broadcast_to(position_ids.astype(jnp.int32),
                                    (B, S)).reshape(BS)

    # Single tiny int32 index input: [word_id | position_id (| token_type_id)].
    cols = [input_ids.reshape(BS, 1).astype(jnp.int32), pos_flat.reshape(BS, 1)]
    # NOTE: reference uses an `if token_type_ids:` truthiness check; only the
    # None / absent case occurs in this demo, so that path matches exactly.
    use_type = token_type_ids is not None
    if use_type:
        cols.append(token_type_ids.reshape(BS, 1).astype(jnp.int32))
    idx2d = jnp.concatenate(cols, axis=1)                # (BS, 2|3) int32

    # Raw 0/1 padding mask (additive form built in-kernel); None -> mask-free kernel.
    mask2d = None
    if attention_mask is not None:
        mask2d = attention_mask.reshape(1, BS).astype(jnp.float32)

    out2d = bert_fused(idx2d, mask2d, packed, cfg, B, S, use_type)
    return out2d.reshape(B, S, H)


# ----------------------------------------------------------------------------- pure-JAX reference
def bert_reference(params, cfg, input_ids):
    B, S = input_ids.shape
    H = cfg.hidden_size
    nh = cfg.num_attention_heads
    dh = H // nh
    f32 = jnp.float32
    eps = cfg.layer_norm_eps

    def ln(v, g, b):
        mu = v.mean(-1, keepdims=True)
        var = ((v - mu) ** 2).mean(-1, keepdims=True)
        return (v - mu) * jax.lax.rsqrt(var + eps) * g + b

    pos = jnp.arange(S)
    emb = (params["word_emb"].astype(f32)[input_ids]
           + params["pos_emb"].astype(f32)[pos][None, :, :])
    x = ln(emb, params["emb_ln_g"].astype(f32), params["emb_ln_b"].astype(f32))

    for l in range(cfg.num_hidden_layers):
        W = lambda n: params[n][l].astype(f32)
        q = x @ W("wq") + W("bq")
        k = x @ W("wk") + W("bk")
        v = x @ W("wv") + W("bv")
        qh = q.reshape(B, S, nh, dh).transpose(0, 2, 1, 3)
        kh = k.reshape(B, S, nh, dh).transpose(0, 2, 1, 3)
        vh = v.reshape(B, S, nh, dh).transpose(0, 2, 1, 3)
        s = jnp.einsum("bhqd,bhkd->bhqk", qh, kh) / math.sqrt(dh)
        p = jax.nn.softmax(s, axis=-1)
        ctx = jnp.einsum("bhqk,bhkd->bhqd", p, vh).transpose(0, 2, 1, 3).reshape(B, S, H)
        attn = ctx @ W("wo") + W("bo")
        h1 = ln(x + attn, W("ln1_g"), W("ln1_b"))
        ff = _gelu_tanh(h1 @ W("wi") + W("bi"))
        ff = ff @ W("wf") + W("bf")
        x = ln(h1 + ff, W("ln2_g"), W("ln2_b"))
    return x


# ----------------------------------------------------------------------------- main
if __name__ == "__main__":
    cfg = Config()
    key = jax.random.PRNGKey(0)
    pkey, ikey = jax.random.split(key)

    params = init_params(cfg, pkey)
    packed = pack_params(params, cfg)

    B, S = 2, 8
    input_ids = jax.random.randint(ikey, (B, S), 0, cfg.vocab_size, dtype=jnp.int32)

    fwd = jax.jit(lambda ids: tt_bert_forward(packed, cfg, ids, attention_mask=None))
    out = jax.block_until_ready(fwd(input_ids))

    assert out.shape == (B, S, cfg.hidden_size)
    assert bool(jnp.all(jnp.isfinite(out.astype(jnp.float32))))

    ref = bert_reference(params, cfg, input_ids)
    err = float(jnp.max(jnp.abs(out.astype(jnp.float32) - ref)))
    assert err < 0.1, f"kernel/reference mismatch: max abs err {err}"

    print("KERNEL_OK")
</pallas_src>

<mosaic_0001>
module attributes {stable_mosaic.version = 11 : i64} {
  func.func @fused_bert_kernel(%arg0: i32, %arg1: memref<16x2xi32, #tpu.memory_space<vmem>>, %arg2: memref<136x32xbf16, #tpu.memory_space<vmem>>, %arg3: memref<2x32x192xbf16, #tpu.memory_space<vmem>>, %arg4: memref<2x64x32xbf16, #tpu.memory_space<vmem>>, %arg5: memref<2x8x128xbf16, #tpu.memory_space<vmem>>, %arg6: memref<16x32xbf16, #tpu.memory_space<vmem>>) attributes {dimension_semantics = [#tpu.dimension_semantics<arbitrary>], iteration_bounds = array<i64: 1>, scalar_prefetch = 0 : i64, scratch_operands = 0 : i64, tpu.core_type = #tpu.core_type<tc>, window_params = [{pipeline_mode = #tpu.pipeline_mode<synchronous>, transform_indices = @transform_0, window_bounds = array<i64: 16, 2>}, {pipeline_mode = #tpu.pipeline_mode<synchronous>, transform_indices = @transform_1, window_bounds = array<i64: 136, 32>}, {pipeline_mode = #tpu.pipeline_mode<synchronous>, transform_indices = @transform_2, window_bounds = array<i64: 2, 32, 192>}, {pipeline_mode = #tpu.pipeline_mode<synchronous>, transform_indices = @transform_3, window_bounds = array<i64: 2, 64, 32>}, {pipeline_mode = #tpu.pipeline_mode<synchronous>, transform_indices = @transform_4, window_bounds = array<i64: 2, 8, 128>}, {pipeline_mode = #tpu.pipeline_mode<synchronous>, transform_indices = @transform_5, window_bounds = array<i64: 16, 32>}]} {
    %c0 = arith.constant 0 : index
    %c0_0 = arith.constant 0 : index
    %0 = vector.load %arg1[%c0, %c0_0] : memref<16x2xi32, #tpu.memory_space<vmem>>, vector<16x2xi32>
    %1 = tpu.iota {dimensions = array<i32: 1>} : vector<16x136xi32>
    %2 = vector.extract_strided_slice %0 {offsets = [0, 0], sizes = [16, 1], strides = [1, 1]} : vector<16x2xi32> to vector<16x1xi32>
    %3 = vector.broadcast %2 : vector<16x1xi32> to vector<16x136xi32>
    %4 = arith.cmpi eq, %1, %3 : vector<16x136xi32>
    %5 = vector.extract_strided_slice %0 {offsets = [0, 1], sizes = [16, 1], strides = [1, 1]} : vector<16x2xi32> to vector<16x1xi32>
    %c100_i32 = arith.constant 100 : i32
    %6 = vector.broadcast %c100_i32 : i32 to vector<16x1xi32>
    %7 = arith.addi %5, %6 : vector<16x1xi32>
    %8 = vector.broadcast %7 : vector<16x1xi32> to vector<16x136xi32>
    %9 = arith.cmpi eq, %1, %8 : vector<16x136xi32>
    %10 = arith.ori %4, %9 : vector<16x136xi1>
    %cst = arith.constant 1.000000e+00 : f32
    %cst_1 = arith.constant 0.000000e+00 : f32
    %11 = vector.broadcast %cst : f32 to vector<16x136xf32>
    %12 = vector.broadcast %cst_1 : f32 to vector<16x136xf32>
    %13 = arith.select %10, %11, %12 : vector<16x136xi1>, vector<16x136xf32>
    %14 = arith.truncf %13 : vector<16x136xf32> to vector<16x136xbf16>
    %c0_2 = arith.constant 0 : index
    %c0_3 = arith.constant 0 : index
    %15 = vector.load %arg2[%c0_2, %c0_3] : memref<136x32xbf16, #tpu.memory_space<vmem>>, vector<136x32xbf16>
    %cst_4 = arith.constant dense<0.000000e+00> : vector<16x32xf32>
    %16 = tpu.matmul %14, %15, %cst_4 {dimension_numbers = #tpu.dot_dimension_numbers<[1], [0], [0], [1], [0, 0, 1, 1], [], []>} : vector<16x136xbf16>, vector<136x32xbf16>, vector<16x32xf32> -> vector<16x32xf32>
    %c0_5 = arith.constant 0 : index
    %c0_6 = arith.constant 0 : index
    %c0_7 = arith.constant 0 : index
    %17 = vector.load %arg5[%c0_5, %c0_6, %c0_7] : memref<2x8x128xbf16, #tpu.memory_space<vmem>>, vector<2x8x128xbf16>
    %18 = arith.extf %17 : vector<2x8x128xbf16> to vector<2x8x128xf32>
    %19 = vector.extract_strided_slice %18 {offsets = [0, 3, 0], sizes = [1, 1, 32], strides = [1, 1, 1]} : vector<2x8x128xf32> to vector<1x1x32xf32>
    %20 = vector.shape_cast %19 : vector<1x1x32xf32> to vector<1x32xf32>
    %21 = vector.extract_strided_slice %18 {offsets = [0, 3, 32], sizes = [1, 1, 32], strides = [1, 1, 1]} : vector<2x8x128xf32> to vector<1x1x32xf32>
    %22 = vector.shape_cast %21 : vector<1x1x32xf32> to vector<1x32xf32>
    %cst_8 = arith.constant dense<0.000000e+00> : vector<16xf32>
    %23 = vector.multi_reduction <add>, %16, %cst_8 [1] : vector<16x32xf32> to vector<16xf32>
    %24 = vector.shape_cast %23 : vector<16xf32> to vector<16x1xf32>
    %cst_9 = arith.constant 3.200000e+01 : f32
    %25 = vector.broadcast %cst_9 : f32 to vector<16x1xf32>
    %26 = arith.divf %24, %25 : vector<16x1xf32>
    %27 = vector.broadcast %26 : vector<16x1xf32> to vector<16x32xf32>
    %28 = arith.subf %16, %27 : vector<16x32xf32>
    %29 = arith.mulf %28, %28 : vector<16x32xf32>
    %cst_10 = arith.constant dense<0.000000e+00> : vector<16xf32>
    %30 = vector.multi_reduction <add>, %29, %cst_10 [1] : vector<16x32xf32> to vector<16xf32>
    %31 = vector.shape_cast %30 : vector<16xf32> to vector<16x1xf32>
    %cst_11 = arith.constant 3.200000e+01 : f32
    %32 = vector.broadcast %cst_11 : f32 to vector<16x1xf32>
    %33 = arith.divf %31, %32 : vector<16x1xf32>
    %34 = vector.broadcast %26 : vector<16x1xf32> to vector<16x32xf32>
    %35 = arith.subf %16, %34 : vector<16x32xf32>
    %cst_12 = arith.constant 9.99999996E-13 : f32
    %36 = vector.broadcast %cst_12 : f32 to vector<16x1xf32>
    %37 = arith.addf %33, %36 : vector<16x1xf32>
    %38 = math.rsqrt %37 : vector<16x1xf32>
    %39 = vector.broadcast %38 : vector<16x1xf32> to vector<16x32xf32>
    %40 = arith.mulf %35, %39 : vector<16x32xf32>
    %41 = vector.broadcast %20 : vector<1x32xf32> to vector<16x32xf32>
    %42 = arith.mulf %40, %41 : vector<16x32xf32>
    %43 = vector.broadcast %22 : vector<1x32xf32> to vector<16x32xf32>
    %44 = arith.addf %42, %43 : vector<16x32xf32>
    %45 = tpu.iota {dimensions = array<i32: 0>} : vector<16x16xi32>
    %46 = arith.sitofp %45 : vector<16x16xi32> to vector<16x16xf32>
    %47 = tpu.iota {dimensions = array<i32: 1>} : vector<16x16xi32>
    %48 = arith.sitofp %47 : vector<16x16xi32> to vector<16x16xf32>
    %cst_13 = arith.constant 5.000000e-01 : f32
    %49 = vector.broadcast %cst_13 : f32 to vector<16x16xf32>
    %50 = arith.addf %46, %49 : vector<16x16xf32>
    %cst_14 = arith.constant 1.250000e-01 : f32
    %51 = vector.broadcast %cst_14 : f32 to vector<16x16xf32>
    %52 = arith.mulf %50, %51 : vector<16x16xf32>
    %53 = math.floor %52 : vector<16x16xf32>
    %cst_15 = arith.constant 5.000000e-01 : f32
    %54 = vector.broadcast %cst_15 : f32 to vector<16x16xf32>
    %55 = arith.addf %48, %54 : vector<16x16xf32>
    %cst_16 = arith.constant 1.250000e-01 : f32
    %56 = vector.broadcast %cst_16 : f32 to vector<16x16xf32>
    %57 = arith.mulf %55, %56 : vector<16x16xf32>
    %58 = math.floor %57 : vector<16x16xf32>
    %59 = arith.cmpf oeq, %53, %58 : vector<16x16xf32>
    %cst_17 = arith.constant 0.000000e+00 : f32
    %cst_18 = arith.constant -1.000000e+09 : f32
    %60 = vector.broadcast %cst_17 : f32 to vector<16x16xf32>
    %61 = vector.broadcast %cst_18 : f32 to vector<16x16xf32>
    %62 = arith.select %59, %60, %61 : vector<16x16xi1>, vector<16x16xf32>
    %c0_19 = arith.constant 0 : index
    %c0_20 = arith.constant 0 : index
    %c0_21 = arith.constant 0 : index
    %63 = vector.load %arg3[%c0_19, %c0_20, %c0_21] : memref<2x32x192xbf16, #tpu.memory_space<vmem>>, vector<1x32x192xbf16>
    %64 = vector.shape_cast %63 : vector<1x32x192xbf16> to vector<32x192xbf16>
    %65 = vector.extract_strided_slice %18 {offsets = [0, 0, 0], sizes = [1, 8, 128], strides = [1, 1, 1]} : vector<2x8x128xf32> to vector<1x8x128xf32>
    %66 = vector.shape_cast %65 : vector<1x8x128xf32> to vector<8x128xf32>
    %67 = vector.extract_strided_slice %66 {offsets = [0, 0], sizes = [1, 96], strides = [1, 1]} : vector<8x128xf32> to vector<1x96xf32>
    %68 = vector.extract_strided_slice %66 {offsets = [0, 96], sizes = [1, 32], strides = [1, 1]} : vector<8x128xf32> to vector<1x32xf32>
    %69 = vector.extract_strided_slice %66 {offsets = [1, 0], sizes = [1, 64], strides = [1, 1]} : vector<8x128xf32> to vector<1x64xf32>
    %70 = vector.extract_strided_slice %66 {offsets = [1, 64], sizes = [1, 32], strides = [1, 1]} : vector<8x128xf32> to vector<1x32xf32>
    %71 = vector.extract_strided_slice %66 {offsets = [2, 0], sizes = [1, 32], strides = [1, 1]} : vector<8x128xf32> to vector<1x32xf32>
    %72 = vector.extract_strided_slice %66 {offsets = [2, 32], sizes = [1, 32], strides = [1, 1]} : vector<8x128xf32> to vector<1x32xf32>
    %73 = vector.extract_strided_slice %66 {offsets = [2, 64], sizes = [1, 32], strides = [1, 1]} : vector<8x128xf32> to vector<1x32xf32>
    %74 = vector.extract_strided_slice %66 {offsets = [2, 96], sizes = [1, 32], strides = [1, 1]} : vector<8x128xf32> to vector<1x32xf32>
    %75 = arith.truncf %44 : vector<16x32xf32> to vector<16x32xbf16>
    %76 = vector.extract_strided_slice %64 {offsets = [0, 0], sizes = [32, 96], strides = [1, 1]} : vector<32x192xbf16> to vector<32x96xbf16>
    %cst_22 = arith.constant dense<0.000000e+00> : vector<16x96xf32>
    %77 = tpu.matmul %75, %76, %cst_22 {dimension_numbers = #tpu.dot_dimension_numbers<[1], [0], [0], [1], [0, 0, 1, 1], [], []>} : vector<16x32xbf16>, vector<32x96xbf16>, vector<16x96xf32> -> vector<16x96xf32>
    %78 = vector.broadcast %67 : vector<1x96xf32> to vector<16x96xf32>
    %79 = arith.addf %77, %78 : vector<16x96xf32>
    %80 = arith.truncf %79 : vector<16x96xf32> to vector<16x96xbf16>
    %cst_23 = arith.constant 0.000000e+00 : f32
    %81 = vector.broadcast %cst_23 : f32 to vector<16x32xf32>
    %82 = vector.extract_strided_slice %80 {offsets = [0, 0], sizes = [16, 16], strides = [1, 1]} : vector<16x96xbf16> to vector<16x16xbf16>
    %83 = vector.extract_strided_slice %80 {offsets = [0, 32], sizes = [16, 16], strides = [1, 1]} : vector<16x96xbf16> to vector<16x16xbf16>
    %84 = vector.extract_strided_slice %80 {offsets = [0, 64], sizes = [16, 16], strides = [1, 1]} : vector<16x96xbf16> to vector<16x16xbf16>
    %cst_24 = arith.constant dense<0.000000e+00> : vector<16x16xf32>
    %85 = tpu.matmul %82, %83, %cst_24 {dimension_numbers = #tpu.dot_dimension_numbers<[1], [1], [0], [0], [0, 0, 1, 0], [], []>} : vector<16x16xbf16>, vector<16x16xbf16>, vector<16x16xf32> -> vector<16x16xf32>
    %cst_25 = arith.constant 2.500000e-01 : f32
    %86 = vector.broadcast %cst_25 : f32 to vector<16x16xf32>
    %87 = arith.mulf %85, %86 : vector<16x16xf32>
    %88 = arith.addf %87, %62 : vector<16x16xf32>
    %cst_26 = arith.constant dense<0xFF800000> : vector<16xf32>
    %89 = vector.multi_reduction <maximumf>, %88, %cst_26 [1] : vector<16x16xf32> to vector<16xf32>
    %90 = vector.shape_cast %89 : vector<16xf32> to vector<16x1xf32>
    %91 = vector.broadcast %90 : vector<16x1xf32> to vector<16x16xf32>
    %92 = arith.subf %88, %91 : vector<16x16xf32>
    %93 = math.exp %92 : vector<16x16xf32>
    %cst_27 = arith.constant dense<0.000000e+00> : vector<16xf32>
    %94 = vector.multi_reduction <add>, %93, %cst_27 [1] : vector<16x16xf32> to vector<16xf32>
    %95 = vector.shape_cast %94 : vector<16xf32> to vector<16x1xf32>
    %96 = tpu.reciprocal %95 {approx = true} : vector<16x1xf32> -> vector<16x1xf32>
    %97 = vector.broadcast %96 : vector<16x1xf32> to vector<16x16xf32>
    %98 = arith.mulf %93, %97 : vector<16x16xf32>
    %99 = arith.truncf %98 : vector<16x16xf32> to vector<16x16xbf16>
    %cst_28 = arith.constant dense<0.000000e+00> : vector<16x16xf32>
    %100 = tpu.matmul %99, %84, %cst_28 {dimension_numbers = #tpu.dot_dimension_numbers<[1], [0], [0], [1], [0, 0, 1, 1], [], []>} : vector<16x16xbf16>, vector<16x16xbf16>, vector<16x16xf32> -> vector<16x16xf32>
    %101 = arith.truncf %100 : vector<16x16xf32> to vector<16x16xbf16>
    %102 = vector.extract_strided_slice %64 {offsets = [0, 96], sizes = [16, 32], strides = [1, 1]} : vector<32x192xbf16> to vector<16x32xbf16>
    %cst_29 = arith.constant dense<0.000000e+00> : vector<16x32xf32>
    %103 = tpu.matmul %101, %102, %cst_29 {dimension_numbers = #tpu.dot_dimension_numbers<[1], [0], [0], [1], [0, 0, 1, 1], [], []>} : vector<16x16xbf16>, vector<16x32xbf16>, vector<16x32xf32> -> vector<16x32xf32>
    %104 = arith.addf %81, %103 : vector<16x32xf32>
    %105 = vector.extract_strided_slice %80 {offsets = [0, 16], sizes = [16, 16], strides = [1, 1]} : vector<16x96xbf16> to vector<16x16xbf16>
    %106 = vector.extract_strided_slice %80 {offsets = [0, 48], sizes = [16, 16], strides = [1, 1]} : vector<16x96xbf16> to vector<16x16xbf16>
    %107 = vector.extract_strided_slice %80 {offsets = [0, 80], sizes = [16, 16], strides = [1, 1]} : vector<16x96xbf16> to vector<16x16xbf16>
    %cst_30 = arith.constant dense<0.000000e+00> : vector<16x16xf32>
    %108 = tpu.matmul %105, %106, %cst_30 {dimension_numbers = #tpu.dot_dimension_numbers<[1], [1], [0], [0], [0, 0, 1, 0], [], []>} : vector<16x16xbf16>, vector<16x16xbf16>, vector<16x16xf32> -> vector<16x16xf32>
    %cst_31 = arith.constant 2.500000e-01 : f32
    %109 = vector.broadcast %cst_31 : f32 to vector<16x16xf32>
    %110 = arith.mulf %108, %109 : vector<16x16xf32>
    %111 = arith.addf %110, %62 : vector<16x16xf32>
    %cst_32 = arith.constant dense<0xFF800000> : vector<16xf32>
    %112 = vector.multi_reduction <maximumf>, %111, %cst_32 [1] : vector<16x16xf32> to vector<16xf32>
    %113 = vector.shape_cast %112 : vector<16xf32> to vector<16x1xf32>
    %114 = vector.broadcast %113 : vector<16x1xf32> to vector<16x16xf32>
    %115 = arith.subf %111, %114 : vector<16x16xf32>
    %116 = math.exp %115 : vector<16x16xf32>
    %cst_33 = arith.constant dense<0.000000e+00> : vector<16xf32>
    %117 = vector.multi_reduction <add>, %116, %cst_33 [1] : vector<16x16xf32> to vector<16xf32>
    %118 = vector.shape_cast %117 : vector<16xf32> to vector<16x1xf32>
    %119 = tpu.reciprocal %118 {approx = true} : vector<16x1xf32> -> vector<16x1xf32>
    %120 = vector.broadcast %119 : vector<16x1xf32> to vector<16x16xf32>
    %121 = arith.mulf %116, %120 : vector<16x16xf32>
    %122 = arith.truncf %121 : vector<16x16xf32> to vector<16x16xbf16>
    %cst_34 = arith.constant dense<0.000000e+00> : vector<16x16xf32>
    %123 = tpu.matmul %122, %107, %cst_34 {dimension_numbers = #tpu.dot_dimension_numbers<[1], [0], [0], [1], [0, 0, 1, 1], [], []>} : vector<16x16xbf16>, vector<16x16xbf16>, vector<16x16xf32> -> vector<16x16xf32>
    %124 = arith.truncf %123 : vector<16x16xf32> to vector<16x16xbf16>
    %125 = vector.extract_strided_slice %64 {offsets = [16, 96], sizes = [16, 32], strides = [1, 1]} : vector<32x192xbf16> to vector<16x32xbf16>
    %cst_35 = arith.constant dense<0.000000e+00> : vector<16x32xf32>
    %126 = tpu.matmul %124, %125, %cst_35 {dimension_numbers = #tpu.dot_dimension_numbers<[1], [0], [0], [1], [0, 0, 1, 1], [], []>} : vector<16x16xbf16>, vector<16x32xbf16>, vector<16x32xf32> -> vector<16x32xf32>
    %127 = arith.addf %104, %126 : vector<16x32xf32>
    %128 = vector.broadcast %68 : vector<1x32xf32> to vector<16x32xf32>
    %129 = arith.addf %127, %128 : vector<16x32xf32>
    %130 = arith.addf %44, %129 : vector<16x32xf32>
    %cst_36 = arith.constant dense<0.000000e+00> : vector<16xf32>
    %131 = vector.multi_reduction <add>, %130, %cst_36 [1] : vector<16x32xf32> to vector<16xf32>
    %132 = vector.shape_cast %131 : vector<16xf32> to vector<16x1xf32>
    %cst_37 = arith.constant 3.200000e+01 : f32
    %133 = vector.broadcast %cst_37 : f32 to vector<16x1xf32>
    %134 = arith.divf %132, %133 : vector<16x1xf32>
    %135 = vector.broadcast %134 : vector<16x1xf32> to vector<16x32xf32>
    %136 = arith.subf %130, %135 : vector<16x32xf32>
    %137 = arith.mulf %136, %136 : vector<16x32xf32>
    %cst_38 = arith.constant dense<0.000000e+00> : vector<16xf32>
    %138 = vector.multi_reduction <add>, %137, %cst_38 [1] : vector<16x32xf32> to vector<16xf32>
    %139 = vector.shape_cast %138 : vector<16xf32> to vector<16x1xf32>
    %cst_39 = arith.constant 3.200000e+01 : f32
    %140 = vector.broadcast %cst_39 : f32 to vector<16x1xf32>
    %141 = arith.divf %139, %140 : vector<16x1xf32>
    %142 = vector.broadcast %134 : vector<16x1xf32> to vector<16x32xf32>
    %143 = arith.subf %130, %142 : vector<16x32xf32>
    %cst_40 = arith.constant 9.99999996E-13 : f32
    %144 = vector.broadcast %cst_40 : f32 to vector<16x1xf32>
    %145 = arith.addf %141, %144 : vector<16x1xf32>
    %146 = math.rsqrt %145 : vector<16x1xf32>
    %147 = vector.broadcast %146 : vector<16x1xf32> to vector<16x32xf32>
    %148 = arith.mulf %143, %147 : vector<16x32xf32>
    %149 = vector.broadcast %71 : vector<1x32xf32> to vector<16x32xf32>
    %150 = arith.mulf %148, %149 : vector<16x32xf32>
    %151 = vector.broadcast %72 : vector<1x32xf32> to vector<16x32xf32>
    %152 = arith.addf %150, %151 : vector<16x32xf32>
    %153 = arith.truncf %152 : vector<16x32xf32> to vector<16x32xbf16>
    %154 = vector.extract_strided_slice %64 {offsets = [0, 128], sizes = [32, 64], strides = [1, 1]} : vector<32x192xbf16> to vector<32x64xbf16>
    %cst_41 = arith.constant dense<0.000000e+00> : vector<16x64xf32>
    %155 = tpu.matmul %153, %154, %cst_41 {dimension_numbers = #tpu.dot_dimension_numbers<[1], [0], [0], [1], [0, 0, 1, 1], [], []>} : vector<16x32xbf16>, vector<32x64xbf16>, vector<16x64xf32> -> vector<16x64xf32>
    %156 = vector.broadcast %69 : vector<1x64xf32> to vector<16x64xf32>
    %157 = arith.addf %155, %156 : vector<16x64xf32>
    %cst_42 = arith.constant 5.000000e-01 : f32
    %158 = vector.broadcast %cst_42 : f32 to vector<16x64xf32>
    %159 = arith.mulf %158, %157 : vector<16x64xf32>
    %cst_43 = arith.constant 4.471500e-02 : f32
    %160 = vector.broadcast %cst_43 : f32 to vector<16x64xf32>
    %161 = arith.mulf %160, %157 : vector<16x64xf32>
    %162 = arith.mulf %161, %157 : vector<16x64xf32>
    %163 = arith.mulf %162, %157 : vector<16x64xf32>
    %164 = arith.addf %157, %163 : vector<16x64xf32>
    %cst_44 = arith.constant 0.797884583 : f32
    %165 = vector.broadcast %cst_44 : f32 to vector<16x64xf32>
    %166 = arith.mulf %165, %164 : vector<16x64xf32>
    %167 = math.tanh %166 : vector<16x64xf32>
    %cst_45 = arith.constant 1.000000e+00 : f32
    %168 = vector.broadcast %cst_45 : f32 to vector<16x64xf32>
    %169 = arith.addf %168, %167 : vector<16x64xf32>
    %170 = arith.mulf %159, %169 : vector<16x64xf32>
    %171 = arith.truncf %170 : vector<16x64xf32> to vector<16x64xbf16>
    %c0_46 = arith.constant 0 : index
    %c0_47 = arith.constant 0 : index
    %c0_48 = arith.constant 0 : index
    %172 = vector.load %arg4[%c0_46, %c0_47, %c0_48] : memref<2x64x32xbf16, #tpu.memory_space<vmem>>, vector<1x64x32xbf16>
    %173 = vector.shape_cast %172 : vector<1x64x32xbf16> to vector<64x32xbf16>
    %cst_49 = arith.constant dense<0.000000e+00> : vector<16x32xf32>
    %174 = tpu.matmul %171, %173, %cst_49 {dimension_numbers = #tpu.dot_dimension_numbers<[1], [0], [0], [1], [0, 0, 1, 1], [], []>} : vector<16x64xbf16>, vector<64x32xbf16>, vector<16x32xf32> -> vector<16x32xf32>
    %175 = vector.broadcast %70 : vector<1x32xf32> to vector<16x32xf32>
    %176 = arith.addf %174, %175 : vector<16x32xf32>
    %177 = arith.addf %152, %176 : vector<16x32xf32>
    %cst_50 = arith.constant dense<0.000000e+00> : vector<16xf32>
    %178 = vector.multi_reduction <add>, %177, %cst_50 [1] : vector<16x32xf32> to vector<16xf32>
    %179 = vector.shape_cast %178 : vector<16xf32> to vector<16x1xf32>
    %cst_51 = arith.constant 3.200000e+01 : f32
    %180 = vector.broadcast %cst_51 : f32 to vector<16x1xf32>
    %181 = arith.divf %179, %180 : vector<16x1xf32>
    %182 = vector.broadcast %181 : vector<16x1xf32> to vector<16x32xf32>
    %183 = arith.subf %177, %182 : vector<16x32xf32>
    %184 = arith.mulf %183, %183 : vector<16x32xf32>
    %cst_52 = arith.constant dense<0.000000e+00> : vector<16xf32>
    %185 = vector.multi_reduction <add>, %184, %cst_52 [1] : vector<16x32xf32> to vector<16xf32>
    %186 = vector.shape_cast %185 : vector<16xf32> to vector<16x1xf32>
    %cst_53 = arith.constant 3.200000e+01 : f32
    %187 = vector.broadcast %cst_53 : f32 to vector<16x1xf32>
    %188 = arith.divf %186, %187 : vector<16x1xf32>
    %189 = vector.broadcast %181 : vector<16x1xf32> to vector<16x32xf32>
    %190 = arith.subf %177, %189 : vector<16x32xf32>
    %cst_54 = arith.constant 9.99999996E-13 : f32
    %191 = vector.broadcast %cst_54 : f32 to vector<16x1xf32>
    %192 = arith.addf %188, %191 : vector<16x1xf32>
    %193 = math.rsqrt %192 : vector<16x1xf32>
    %194 = vector.broadcast %193 : vector<16x1xf32> to vector<16x32xf32>
    %195 = arith.mulf %190, %194 : vector<16x32xf32>
    %196 = vector.broadcast %73 : vector<1x32xf32> to vector<16x32xf32>
    %197 = arith.mulf %195, %196 : vector<16x32xf32>
    %198 = vector.broadcast %74 : vector<1x32xf32> to vector<16x32xf32>
    %199 = arith.addf %197, %198 : vector<16x32xf32>
    %c1 = arith.constant 1 : index
    %c0_55 = arith.constant 0 : index
    %c0_56 = arith.constant 0 : index
    %200 = vector.load %arg3[%c1, %c0_55, %c0_56] : memref<2x32x192xbf16, #tpu.memory_space<vmem>>, vector<1x32x192xbf16>
    %201 = vector.shape_cast %200 : vector<1x32x192xbf16> to vector<32x192xbf16>
    %202 = vector.extract_strided_slice %18 {offsets = [1, 0, 0], sizes = [1, 8, 128], strides = [1, 1, 1]} : vector<2x8x128xf32> to vector<1x8x128xf32>
    %203 = vector.shape_cast %202 : vector<1x8x128xf32> to vector<8x128xf32>
    %204 = vector.extract_strided_slice %203 {offsets = [0, 0], sizes = [1, 96], strides = [1, 1]} : vector<8x128xf32> to vector<1x96xf32>
    %205 = vector.extract_strided_slice %203 {offsets = [0, 96], sizes = [1, 32], strides = [1, 1]} : vector<8x128xf32> to vector<1x32xf32>
    %206 = vector.extract_strided_slice %203 {offsets = [1, 0], sizes = [1, 64], strides = [1, 1]} : vector<8x128xf32> to vector<1x64xf32>
    %207 = vector.extract_strided_slice %203 {offsets = [1, 64], sizes = [1, 32], strides = [1, 1]} : vector<8x128xf32> to vector<1x32xf32>
    %208 = vector.extract_strided_slice %203 {offsets = [2, 0], sizes = [1, 32], strides = [1, 1]} : vector<8x128xf32> to vector<1x32xf32>
    %209 = vector.extract_strided_slice %203 {offsets = [2, 32], sizes = [1, 32], strides = [1, 1]} : vector<8x128xf32> to vector<1x32xf32>
    %210 = vector.extract_strided_slice %203 {offsets = [2, 64], sizes = [1, 32], strides = [1, 1]} : vector<8x128xf32> to vector<1x32xf32>
    %211 = vector.extract_strided_slice %203 {offsets = [2, 96], sizes = [1, 32], strides = [1, 1]} : vector<8x128xf32> to vector<1x32xf32>
    %212 = arith.truncf %199 : vector<16x32xf32> to vector<16x32xbf16>
    %213 = vector.extract_strided_slice %201 {offsets = [0, 0], sizes = [32, 96], strides = [1, 1]} : vector<32x192xbf16> to vector<32x96xbf16>
    %cst_57 = arith.constant dense<0.000000e+00> : vector<16x96xf32>
    %214 = tpu.matmul %212, %213, %cst_57 {dimension_numbers = #tpu.dot_dimension_numbers<[1], [0], [0], [1], [0, 0, 1, 1], [], []>} : vector<16x32xbf16>, vector<32x96xbf16>, vector<16x96xf32> -> vector<16x96xf32>
    %215 = vector.broadcast %204 : vector<1x96xf32> to vector<16x96xf32>
    %216 = arith.addf %214, %215 : vector<16x96xf32>
    %217 = arith.truncf %216 : vector<16x96xf32> to vector<16x96xbf16>
    %cst_58 = arith.constant 0.000000e+00 : f32
    %218 = vector.broadcast %cst_58 : f32 to vector<16x32xf32>
    %219 = vector.extract_strided_slice %217 {offsets = [0, 0], sizes = [16, 16], strides = [1, 1]} : vector<16x96xbf16> to vector<16x16xbf16>
    %220 = vector.extract_strided_slice %217 {offsets = [0, 32], sizes = [16, 16], strides = [1, 1]} : vector<16x96xbf16> to vector<16x16xbf16>
    %221 = vector.extract_strided_slice %217 {offsets = [0, 64], sizes = [16, 16], strides = [1, 1]} : vector<16x96xbf16> to vector<16x16xbf16>
    %cst_59 = arith.constant dense<0.000000e+00> : vector<16x16xf32>
    %222 = tpu.matmul %219, %220, %cst_59 {dimension_numbers = #tpu.dot_dimension_numbers<[1], [1], [0], [0], [0, 0, 1, 0], [], []>} : vector<16x16xbf16>, vector<16x16xbf16>, vector<16x16xf32> -> vector<16x16xf32>
    %cst_60 = arith.constant 2.500000e-01 : f32
    %223 = vector.broadcast %cst_60 : f32 to vector<16x16xf32>
    %224 = arith.mulf %222, %223 : vector<16x16xf32>
    %225 = arith.addf %224, %62 : vector<16x16xf32>
    %cst_61 = arith.constant dense<0xFF800000> : vector<16xf32>
    %226 = vector.multi_reduction <maximumf>, %225, %cst_61 [1] : vector<16x16xf32> to vector<16xf32>
    %227 = vector.shape_cast %226 : vector<16xf32> to vector<16x1xf32>
    %228 = vector.broadcast %227 : vector<16x1xf32> to vector<16x16xf32>
    %229 = arith.subf %225, %228 : vector<16x16xf32>
    %230 = math.exp %229 : vector<16x16xf32>
    %cst_62 = arith.constant dense<0.000000e+00> : vector<16xf32>
    %231 = vector.multi_reduction <add>, %230, %cst_62 [1] : vector<16x16xf32> to vector<16xf32>
    %232 = vector.shape_cast %231 : vector<16xf32> to vector<16x1xf32>
    %233 = tpu.reciprocal %232 {approx = true} : vector<16x1xf32> -> vector<16x1xf32>
    %234 = vector.broadcast %233 : vector<16x1xf32> to vector<16x16xf32>
    %235 = arith.mulf %230, %234 : vector<16x16xf32>
    %236 = arith.truncf %235 : vector<16x16xf32> to vector<16x16xbf16>
    %cst_63 = arith.constant dense<0.000000e+00> : vector<16x16xf32>
    %237 = tpu.matmul %236, %221, %cst_63 {dimension_numbers = #tpu.dot_dimension_numbers<[1], [0], [0], [1], [0, 0, 1, 1], [], []>} : vector<16x16xbf16>, vector<16x16xbf16>, vector<16x16xf32> -> vector<16x16xf32>
    %238 = arith.truncf %237 : vector<16x16xf32> to vector<16x16xbf16>
    %239 = vector.extract_strided_slice %201 {offsets = [0, 96], sizes = [16, 32], strides = [1, 1]} : vector<32x192xbf16> to vector<16x32xbf16>
    %cst_64 = arith.constant dense<0.000000e+00> : vector<16x32xf32>
    %240 = tpu.matmul %238, %239, %cst_64 {dimension_numbers = #tpu.dot_dimension_numbers<[1], [0], [0], [1], [0, 0, 1, 1], [], []>} : vector<16x16xbf16>, vector<16x32xbf16>, vector<16x32xf32> -> vector<16x32xf32>
    %241 = arith.addf %218, %240 : vector<16x32xf32>
    %242 = vector.extract_strided_slice %217 {offsets = [0, 16], sizes = [16, 16], strides = [1, 1]} : vector<16x96xbf16> to vector<16x16xbf16>
    %243 = vector.extract_strided_slice %217 {offsets = [0, 48], sizes = [16, 16], strides = [1, 1]} : vector<16x96xbf16> to vector<16x16xbf16>
    %244 = vector.extract_strided_slice %217 {offsets = [0, 80], sizes = [16, 16], strides = [1, 1]} : vector<16x96xbf16> to vector<16x16xbf16>
    %cst_65 = arith.constant dense<0.000000e+00> : vector<16x16xf32>
    %245 = tpu.matmul %242, %243, %cst_65 {dimension_numbers = #tpu.dot_dimension_numbers<[1], [1], [0], [0], [0, 0, 1, 0], [], []>} : vector<16x16xbf16>, vector<16x16xbf16>, vector<16x16xf32> -> vector<16x16xf32>
    %cst_66 = arith.constant 2.500000e-01 : f32
    %246 = vector.broadcast %cst_66 : f32 to vector<16x16xf32>
    %247 = arith.mulf %245, %246 : vector<16x16xf32>
    %248 = arith.addf %247, %62 : vector<16x16xf32>
    %cst_67 = arith.constant dense<0xFF800000> : vector<16xf32>
    %249 = vector.multi_reduction <maximumf>, %248, %cst_67 [1] : vector<16x16xf32> to vector<16xf32>
    %250 = vector.shape_cast %249 : vector<16xf32> to vector<16x1xf32>
    %251 = vector.broadcast %250 : vector<16x1xf32> to vector<16x16xf32>
    %252 = arith.subf %248, %251 : vector<16x16xf32>
    %253 = math.exp %252 : vector<16x16xf32>
    %cst_68 = arith.constant dense<0.000000e+00> : vector<16xf32>
    %254 = vector.multi_reduction <add>, %253, %cst_68 [1] : vector<16x16xf32> to vector<16xf32>
    %255 = vector.shape_cast %254 : vector<16xf32> to vector<16x1xf32>
    %256 = tpu.reciprocal %255 {approx = true} : vector<16x1xf32> -> vector<16x1xf32>
    %257 = vector.broadcast %256 : vector<16x1xf32> to vector<16x16xf32>
    %258 = arith.mulf %253, %257 : vector<16x16xf32>
    %259 = arith.truncf %258 : vector<16x16xf32> to vector<16x16xbf16>
    %cst_69 = arith.constant dense<0.000000e+00> : vector<16x16xf32>
    %260 = tpu.matmul %259, %244, %cst_69 {dimension_numbers = #tpu.dot_dimension_numbers<[1], [0], [0], [1], [0, 0, 1, 1], [], []>} : vector<16x16xbf16>, vector<16x16xbf16>, vector<16x16xf32> -> vector<16x16xf32>
    %261 = arith.truncf %260 : vector<16x16xf32> to vector<16x16xbf16>
    %262 = vector.extract_strided_slice %201 {offsets = [16, 96], sizes = [16, 32], strides = [1, 1]} : vector<32x192xbf16> to vector<16x32xbf16>
    %cst_70 = arith.constant dense<0.000000e+00> : vector<16x32xf32>
    %263 = tpu.matmul %261, %262, %cst_70 {dimension_numbers = #tpu.dot_dimension_numbers<[1], [0], [0], [1], [0, 0, 1, 1], [], []>} : vector<16x16xbf16>, vector<16x32xbf16>, vector<16x32xf32> -> vector<16x32xf32>
    %264 = arith.addf %241, %263 : vector<16x32xf32>
    %265 = vector.broadcast %205 : vector<1x32xf32> to vector<16x32xf32>
    %266 = arith.addf %264, %265 : vector<16x32xf32>
    %267 = arith.addf %199, %266 : vector<16x32xf32>
    %cst_71 = arith.constant dense<0.000000e+00> : vector<16xf32>
    %268 = vector.multi_reduction <add>, %267, %cst_71 [1] : vector<16x32xf32> to vector<16xf32>
    %269 = vector.shape_cast %268 : vector<16xf32> to vector<16x1xf32>
    %cst_72 = arith.constant 3.200000e+01 : f32
    %270 = vector.broadcast %cst_72 : f32 to vector<16x1xf32>
    %271 = arith.divf %269, %270 : vector<16x1xf32>
    %272 = vector.broadcast %271 : vector<16x1xf32> to vector<16x32xf32>
    %273 = arith.subf %267, %272 : vector<16x32xf32>
    %274 = arith.mulf %273, %273 : vector<16x32xf32>
    %cst_73 = arith.constant dense<0.000000e+00> : vector<16xf32>
    %275 = vector.multi_reduction <add>, %274, %cst_73 [1] : vector<16x32xf32> to vector<16xf32>
    %276 = vector.shape_cast %275 : vector<16xf32> to vector<16x1xf32>
    %cst_74 = arith.constant 3.200000e+01 : f32
    %277 = vector.broadcast %cst_74 : f32 to vector<16x1xf32>
    %278 = arith.divf %276, %277 : vector<16x1xf32>
    %279 = vector.broadcast %271 : vector<16x1xf32> to vector<16x32xf32>
    %280 = arith.subf %267, %279 : vector<16x32xf32>
    %cst_75 = arith.constant 9.99999996E-13 : f32
    %281 = vector.broadcast %cst_75 : f32 to vector<16x1xf32>
    %282 = arith.addf %278, %281 : vector<16x1xf32>
    %283 = math.rsqrt %282 : vector<16x1xf32>
    %284 = vector.broadcast %283 : vector<16x1xf32> to vector<16x32xf32>
    %285 = arith.mulf %280, %284 : vector<16x32xf32>
    %286 = vector.broadcast %208 : vector<1x32xf32> to vector<16x32xf32>
    %287 = arith.mulf %285, %286 : vector<16x32xf32>
    %288 = vector.broadcast %209 : vector<1x32xf32> to vector<16x32xf32>
    %289 = arith.addf %287, %288 : vector<16x32xf32>
    %290 = arith.truncf %289 : vector<16x32xf32> to vector<16x32xbf16>
    %291 = vector.extract_strided_slice %201 {offsets = [0, 128], sizes = [32, 64], strides = [1, 1]} : vector<32x192xbf16> to vector<32x64xbf16>
    %cst_76 = arith.constant dense<0.000000e+00> : vector<16x64xf32>
    %292 = tpu.matmul %290, %291, %cst_76 {dimension_numbers = #tpu.dot_dimension_numbers<[1], [0], [0], [1], [0, 0, 1, 1], [], []>} : vector<16x32xbf16>, vector<32x64xbf16>, vector<16x64xf32> -> vector<16x64xf32>
    %293 = vector.broadcast %206 : vector<1x64xf32> to vector<16x64xf32>
    %294 = arith.addf %292, %293 : vector<16x64xf32>
    %cst_77 = arith.constant 5.000000e-01 : f32
    %295 = vector.broadcast %cst_77 : f32 to vector<16x64xf32>
    %296 = arith.mulf %295, %294 : vector<16x64xf32>
    %cst_78 = arith.constant 4.471500e-02 : f32
    %297 = vector.broadcast %cst_78 : f32 to vector<16x64xf32>
    %298 = arith.mulf %297, %294 : vector<16x64xf32>
    %299 = arith.mulf %298, %294 : vector<16x64xf32>
    %300 = arith.mulf %299, %294 : vector<16x64xf32>
    %301 = arith.addf %294, %300 : vector<16x64xf32>
    %cst_79 = arith.constant 0.797884583 : f32
    %302 = vector.broadcast %cst_79 : f32 to vector<16x64xf32>
    %303 = arith.mulf %302, %301 : vector<16x64xf32>
    %304 = math.tanh %303 : vector<16x64xf32>
    %cst_80 = arith.constant 1.000000e+00 : f32
    %305 = vector.broadcast %cst_80 : f32 to vector<16x64xf32>
    %306 = arith.addf %305, %304 : vector<16x64xf32>
    %307 = arith.mulf %296, %306 : vector<16x64xf32>
    %308 = arith.truncf %307 : vector<16x64xf32> to vector<16x64xbf16>
    %c1_81 = arith.constant 1 : index
    %c0_82 = arith.constant 0 : index
    %c0_83 = arith.constant 0 : index
    %309 = vector.load %arg4[%c1_81, %c0_82, %c0_83] : memref<2x64x32xbf16, #tpu.memory_space<vmem>>, vector<1x64x32xbf16>
    %310 = vector.shape_cast %309 : vector<1x64x32xbf16> to vector<64x32xbf16>
    %cst_84 = arith.constant dense<0.000000e+00> : vector<16x32xf32>
    %311 = tpu.matmul %308, %310, %cst_84 {dimension_numbers = #tpu.dot_dimension_numbers<[1], [0], [0], [1], [0, 0, 1, 1], [], []>} : vector<16x64xbf16>, vector<64x32xbf16>, vector<16x32xf32> -> vector<16x32xf32>
    %312 = vector.broadcast %207 : vector<1x32xf32> to vector<16x32xf32>
    %313 = arith.addf %311, %312 : vector<16x32xf32>
    %314 = arith.addf %289, %313 : vector<16x32xf32>
    %cst_85 = arith.constant dense<0.000000e+00> : vector<16xf32>
    %315 = vector.multi_reduction <add>, %314, %cst_85 [1] : vector<16x32xf32> to vector<16xf32>
    %316 = vector.shape_cast %315 : vector<16xf32> to vector<16x1xf32>
    %cst_86 = arith.constant 3.200000e+01 : f32
    %317 = vector.broadcast %cst_86 : f32 to vector<16x1xf32>
    %318 = arith.divf %316, %317 : vector<16x1xf32>
    %319 = vector.broadcast %318 : vector<16x1xf32> to vector<16x32xf32>
    %320 = arith.subf %314, %319 : vector<16x32xf32>
    %321 = arith.mulf %320, %320 : vector<16x32xf32>
    %cst_87 = arith.constant dense<0.000000e+00> : vector<16xf32>
    %322 = vector.multi_reduction <add>, %321, %cst_87 [1] : vector<16x32xf32> to vector<16xf32>
    %323 = vector.shape_cast %322 : vector<16xf32> to vector<16x1xf32>
    %cst_88 = arith.constant 3.200000e+01 : f32
    %324 = vector.broadcast %cst_88 : f32 to vector<16x1xf32>
    %325 = arith.divf %323, %324 : vector<16x1xf32>
    %326 = vector.broadcast %318 : vector<16x1xf32> to vector<16x32xf32>
    %327 = arith.subf %314, %326 : vector<16x32xf32>
    %cst_89 = arith.constant 9.99999996E-13 : f32
    %328 = vector.broadcast %cst_89 : f32 to vector<16x1xf32>
    %329 = arith.addf %325, %328 : vector<16x1xf32>
    %330 = math.rsqrt %329 : vector<16x1xf32>
    %331 = vector.broadcast %330 : vector<16x1xf32> to vector<16x32xf32>
    %332 = arith.mulf %327, %331 : vector<16x32xf32>
    %333 = vector.broadcast %210 : vector<1x32xf32> to vector<16x32xf32>
    %334 = arith.mulf %332, %333 : vector<16x32xf32>
    %335 = vector.broadcast %211 : vector<1x32xf32> to vector<16x32xf32>
    %336 = arith.addf %334, %335 : vector<16x32xf32>
    %337 = arith.truncf %336 : vector<16x32xf32> to vector<16x32xbf16>
    %c0_90 = arith.constant 0 : index
    %c0_91 = arith.constant 0 : index
    %338 = vector.load %arg6[%c0_90, %c0_91] : memref<16x32xbf16, #tpu.memory_space<vmem>>, vector<16x32xbf16>
    tpu.vector_store %arg6[%c0_90, %c0_91], %337 {strides = array<i32>} : memref<16x32xbf16, #tpu.memory_space<vmem>>, vector<16x32xbf16>,
    return
  }
  func.func @transform_0(%arg0: i32) -> (i32, i32) {
    %c0_i32 = arith.constant 0 : i32
    %c0_i32_0 = arith.constant 0 : i32
    %c0_i32_1 = arith.constant 0 : i32
    return %c0_i32, %c0_i32_0 : i32, i32
  }
  func.func @transform_1(%arg0: i32) -> (i32, i32) {
    %c0_i32 = arith.constant 0 : i32
    %c0_i32_0 = arith.constant 0 : i32
    %c0_i32_1 = arith.constant 0 : i32
    return %c0_i32, %c0_i32_0 : i32, i32
  }
  func.func @transform_2(%arg0: i32) -> (i32, i32, i32) {
    %c0_i32 = arith.constant 0 : i32
    %c0_i32_0 = arith.constant 0 : i32
    %c0_i32_1 = arith.constant 0 : i32
    %c0_i32_2 = arith.constant 0 : i32
    return %c0_i32, %c0_i32_0, %c0_i32_1 : i32, i32, i32
  }
  func.func @transform_3(%arg0: i32) -> (i32, i32, i32) {
    %c0_i32 = arith.constant 0 : i32
    %c0_i32_0 = arith.constant 0 : i32
    %c0_i32_1 = arith.constant 0 : i32
    %c0_i32_2 = arith.constant 0 : i32
    return %c0_i32, %c0_i32_0, %c0_i32_1 : i32, i32, i32
  }
  func.func @transform_4(%arg0: i32) -> (i32, i32, i32) {
    %c0_i32 = arith.constant 0 : i32
    %c0_i32_0 = arith.constant 0 : i32
    %c0_i32_1 = arith.constant 0 : i32
    %c0_i32_2 = arith.constant 0 : i32
    return %c0_i32, %c0_i32_0, %c0_i32_1 : i32, i32, i32
  }
  func.func @transform_5(%arg0: i32) -> (i32, i32) {
    %c0_i32 = arith.constant 0 : i32
    %c0_i32_0 = arith.constant 0 : i32
    %c0_i32_1 = arith.constant 0 : i32
    return %c0_i32, %c0_i32_0 : i32, i32
  }
}

</mosaic_0001>

<bundles_post_ra>
// kernel: _lambda_.1
= control target key start
LH: loop header
LB: loop body
LE: loop exit
PB: predicated region body
PF: predicated region fallthrough
CT: control target
= control target key end

     0   :  { %v1942_v2 = vmov 0   ;;  %v1943_v3 = vmov 1   ;;  %v1944_v9 = vmov 0.0   ;;  %s2360_s0 = inlined_call_operand.vmem [shape: s32[16,2], index: 0, kind: input, shape index: {}]   ;;  %s2361_s1 = inlined_call_operand.vmem [shape: bf16[136,32], index: 1, kind: input, shape index: {}]   ;;  %s2362_s2 = inlined_call_operand.vmem [shape: bf16[2,32,192], index: 2, kind: input, shape index: {}]   ;;  %s2363_s3 = inlined_call_operand.vmem [shape: bf16[2,64,32], index: 3, kind: input, shape index: {}]   ;;  %s2364_s4 = inlined_call_operand.vmem [shape: bf16[2,8,128], index: 4, kind: input, shape index: {}]   ;;  %s2365_s5 = inlined_call_operand.hbm [shape: bf16[16,32], index: 5, kind: output, shape index: {}]  }
   0x1   :  { %v22_v0 = vld [vmem:[%s2360_s0] sm:$0xff]  ;;  %v23_v1 = vld [vmem:[%s2360_s0 + $0x8] sm:$0xff]  ;;  %1826 = vset.pattern.permute.xlu0 %v1942_v2  ;;  %1827 = vset.pattern.permute.xlu1 %v1943_v3  ;;  %v1831_v8 = vld [vmem:[%s2361_s1 + $0x10] sm:$0xff]  }
   0x2   :  { %v37_v4 = vadd.s32 100, %v22_v0  ;;  %v1829_v5 = vld [vmem:[%s2361_s1] sm:$0xff]   ;;  %28 = vperm.xlu0 %1826, %v22_v0   ;;  %135 = vmatprep.subr.bf16.mxu0 %v1942_v2  ;;  %v38_v6 = vadd.s32 100, %v23_v1  ;;  %v1830_v7 = vld [vmem:[%s2361_s1 + $0x8] sm:$0xff]   ;;  %v1832_v10 = vld [vmem:[%s2361_s1 + $0x18] sm:$0xff]  }
   0x3   :  { %136 = vmatpush1.bf16.msra.mxu0 %v1829_v5  ;;  %1692 = vmatprep.subr.bf16.mxu1 %v1944_v9  ;;  %v1833_v11 = vld [vmem:[%s2361_s1 + $0x20] sm:$0xff]  }
   0x4   :  { %40 = vperm.xlu1 %1827, %v37_v4   ;;  %137 = vmatprep.subr.bf16.mxu0 %v1942_v2 }
   0x6   :  { %31 = vperm.xlu0 %1826, %v23_v1  }
   0x7   :  { %138 = vmatpush1.bf16.msra.mxu0 %v1830_v7 }
   0x8   :  { %43 = vperm.xlu1 %1827, %v38_v6   ;;  %139 = vmatprep.subr.bf16.mxu0 %v1942_v2 }
   0xa   :  { %1828 = vset.pattern.permute.xlu0 %v1943_v3 }
   0xb   :  { %140 = vmatpush1.bf16.msra.mxu0 %v1831_v8 }
   0xc   :  { %141 = vmatprep.subr.bf16.mxu0 %v1942_v2 }
   0xf   :  { %142 = vmatpush1.bf16.msra.mxu0 %v1832_v10 }
  0x10   :  { %143 = vmatprep.subr.bf16.mxu0 %v1942_v2 }
  0x11   :  { %10 = vsyncpa [#allocation3], 0  ;;  %v1834_v12 = vld [vmem:[%s2361_s1 + $0x28] sm:$0xff]   ;;  %v1835_v13 = vld [vmem:[%s2361_s1 + $0x30] sm:$0xff]   ;;  %vm131_vm0 = vcmask 1043456   ;;  %v24_v17 = vlaneseq  ;;  %vm127_vm12 = vcmask 64512  }
  0x12   :  { %v1836_v14 = vld [vmem:[%s2361_s1 + $0x38] sm:$0xff]   ;;  %v1837_v15 = vld [vmem:[%s2361_s1 + $0x40] ss:$0 sps:$4 sm:$0xff]   ;;  %v1945_v27 = vmov 1.0|1.0   ;;  %vm180_vm15 = vcmask 261120  }
  0x13   :  { %144 = vmatpush1.bf16.msra.mxu0 %v1833_v11  ;;  %v133_v16 = vsel %vm131_vm0, %v1837_v15, 0  ;;  %v2021_v18 = vand.u32 127, %v24_v17  ;;  %v2032_v34 = vshrl.u32 %v24_v17, 7  ;;  %v2037_v35 = vld [vmem:[%s2364_s4] sm:$0xff]   ;;  %s1946_s15 = smov 96   ;;  %vm1947_vm0 = vmmov 0  }
  0x14   :  { %145 = vmatprep.subr.bf16.mxu0 %v1942_v2  ;;  %v2041_v37 = vunpack.c.l.bf16 %v2037_v35  ;;  %v2050_v49 = vld [vmem:[%s2362_s2] ss:$8 sps:$4 sm:$0xff]   ;;  %v2057_v50 = vld [vmem:[%s2362_s2 + $0x10] ss:$8 sps:$4 sm:$0xff]   ;;  %1694 = vmatprep.mubr.msk.bf16.mxu1 %vm1947_vm0, %v1944_v9  ;;  %s1949_s19 = smov 64   ;;  %s1950_s20 = smov 112  }
  0x15   :  { %v26_v19 = vadd.s32 128, %v2021_v18  ;;  %v210_v36 = vsub.s32 3, %v2032_v34  ;;  %v246_v3 = vsub.s32 0, %v2032_v34  ;;  %v222_v15 = vadd.s32 8, %v2032_v34  ;;  %s1951_s21 = smov 80   ;;  %s1952_s22 = smov 32  }
  0x16   :  { %v225_v17 = vcvt.s32.f32 %v2021_v18  ;;  %s1953_s23 = smov 48  }
  0x17   :  { %146 = vmatpush1.bf16.msra.mxu0 %v1834_v12  ;;  %v211_v38 = vrot.slane %v2041_v37, %v210_v36  ;;  %v2078_v4 = vrot.slane %v2041_v37, %v246_v3 }
  0x18   :  { %147 = vmatprep.subr.bf16.mxu0 %v1942_v2 }
  0x1b   :  { %148 = vmatpush1.bf16.msra.mxu0 %v1835_v13 }
  0x1c   :  { %149 = vmatprep.subr.bf16.mxu0 %v1942_v2 }
  0x1f   :  { %150 = vmatpush1.bf16.msra.mxu0 %v1836_v14 }
  0x20   :  { %151 = vmatprep.subr.bf16.mxu0 %v1942_v2 }
  0x23   :  { %152 = vmatpush1.bf16.msra.mxu0 %v133_v16  ;;  %v223_v16 = vcvt.s32.f32 %v2032_v34 }
  0x24   :  { %1684 = vmatprep.subr.bf16.mxu0 %v1944_v9 }
  0x81   :  { %v29_v20 = vpop.permute.xlu0 %28 }
  0x82   :  { %vm34_vm1 = vcmp.eq.s32.totalorder %v26_v19, %v29_v20  ;;  %vm33_vm8 = vcmp.eq.s32.totalorder %v2021_v18, %v29_v20  ;;  %v226_v20 = vadd.f32 0.5, %v223_v16 }
  0x83   :  { %v41_v21 = vpop.permute.xlu1 %40 }
  0x84   :  { %vm46_vm2 = vcmp.eq.s32.totalorder %v26_v19, %v41_v21  ;;  %vm45_vm9 = vcmp.eq.s32.totalorder %v2021_v18, %v41_v21  ;;  %v232_v21 = vadd.f32 0.5, %v225_v17 }
  0x85   :  { %v32_v22 = vpop.permute.xlu0 %31  ;;  %vm50_vm4 = vmor %vm34_vm1, %vm46_vm2  ;;  %vm308_vm1 = vcmask 130048  }
  0x86   :  { %vm36_vm3 = vcmp.eq.s32.totalorder %v26_v19, %v32_v22  ;;  %vm35_vm5 = vcmp.eq.s32.totalorder %v2021_v18, %v32_v22  ;;  %v54_v24 = vsel %vm50_vm4, 1.0, %v1944_v9  ;;  %vm49_vm13 = vmor %vm33_vm8, %vm45_vm9  ;;  %vm809_vm4 = vcmask 523264  }
  0x87   :  { %v44_v23 = vpop.permute.xlu1 %43 }
  0x88   :  { %vm47_vm6 = vcmp.eq.s32.totalorder %v2021_v18, %v44_v23  ;;  %vm48_vm7 = vcmp.eq.s32.totalorder %v26_v19, %v44_v23  ;;  %v224_v19 = vcvt.s32.f32 %v222_v15  ;;  %v228_v23 = vmul.f32 0.125, %v226_v20 }
  0x89   :  { %vm52_vm10 = vmor %vm36_vm3, %vm48_vm7 }
  0x8a   :  { %vm51_vm11 = vmor %vm35_vm5, %vm47_vm6  ;;  %v56_v25 = vsel %vm52_vm10, 1.0, %v1944_v9  ;;  %v227_v22 = vadd.f32 0.5, %v224_v19  ;;  %vm1553_vm5 = vcmask 257024  }
  0x8b   :  { %v58_v26 = vpack.c.bf16 %v56_v25, %v54_v24  ;;  %vm1582_vm14 = vmpackc.low %vm51_vm11, %vm49_vm13  ;;  %v233_v24 = vmul.f32 0.125, %v232_v21 }
  0x8c   :  { %v229_v25 = vmul.f32 0.125, %v227_v22 }
  0x8d   :  { %1581 = vmatprep.mubr.msk.bf16.mxu0 %vm127_vm12, %v58_v26  ;;  %v230_v26 = vfloor.f32 %v228_v23 }
  0x8e   :  { %1583 = vmatmul.mubr.msk.bf16.vlgmr.msra.gmra.mrb[0].mxu0 %vm1582_vm14, %v1945_v27  ;;  %v234_v27 = vfloor.f32 %v233_v24 }
  0x8f   :  { %1685 = vmatpush3.bf16.msra.mxu0 %v2050_v49  ;;  %1688 = vmatprep.mubr.msk.bf16.mxu0 %vm1947_vm0, %v1944_v9 }
  0x90   :  { %1686 = vmatprep.subr.bf16.mxu0 %v1944_v9  ;;  %vm235_vm2 = vcmp.eq.f32.partialorder %v230_v26, %v234_v27 }
  0x93   :  { %1687 = vmatpush3.bf16.msra.mxu0 %v2057_v50 }
  0x94   :  { %1716 = vmatprep.subr.bf16.mxu0 %v1944_v9 }
 0x161   :  { %v169_v28 = vpop.f32.mrb[0].mxu0 }
 0x162   :  { %v171_v29 = vpop.f32.mrb[1].mxu0  ;;  %v181_v30 = vsel %vm180_vm15, %v169_v28, 0.0 }
 0x163   :  { %182 = vadd.xlane.f32.xlu0 %v181_v30  ;;  %v172_v31 = vpop.f32.mrb[2].mxu0  ;;  %v1948_v30 = vmov -1e+09  }
 0x164   :  { %v174_v32 = vpop.f32.mrb[3].mxu0  ;;  %v184_v33 = vsel %vm180_vm15, %v172_v31, 0.0 }
 0x165   :  { %185 = vadd.xlane.f32.xlu1 %v184_v33 }
 0x176   :  { %215 = vrot.lane.b32.xlu1 %v211_v38, %s1946_s15 }
 0x1f0   :  { %v183_v39 = vpop.xlane.xlu0 %182 }
 0x1f1   :  { %v188_v40 = vmul.f32 0.03125, %v183_v39 }
 0x1f2   :  { %v186_v41 = vpop.xlane.xlu1 %185 }
 0x1f3   :  { %v190_v42 = vsub.f32 %v169_v28, %v188_v40  ;;  %v189_v43 = vmul.f32 0.03125, %v186_v41  ;;  %v231_v28 = vfloor.f32 %v229_v25 }
 0x1f5   :  { %v191_v44 = vsub.f32 %v172_v31, %v189_v43  ;;  %v192_v45 = vmul.f32 %v190_v42, %v190_v42  ;;  %vm236_vm3 = vcmp.eq.f32.partialorder %v231_v28, %v234_v27  ;;  %v2095_v31 = vsel %vm235_vm2, 0.0, %v1948_v30 }
 0x1f6   :  { %v216_v62 = vpop.permute.xlu1 %215  ;;  %v2097_v18 = vsel %vm236_vm3, 0.0, %v1948_v30 }
 0x1f7   :  { %v194_v46 = vsel %vm180_vm15, %v192_v45, 0.0  ;;  %v193_v47 = vmul.f32 %v191_v44, %v191_v44 }
 0x1f8   :  { %195 = vadd.xlane.f32.xlu0 %v194_v46 }
 0x1f9   :  { %v197_v48 = vsel %vm180_vm15, %v193_v47, 0.0 }
 0x1fc   :  { %198 = vadd.xlane.f32.xlu0 %v197_v48 }
 0x285   :  { %v196_v51 = vpop.xlane.xlu0 %195 }
 0x286   :  { %v200_v52 = vmul.f32 0.03125, %v196_v51 }
 0x288   :  { %v202_v53 = vadd.f32 1e-12, %v200_v52 }
 0x289   :  { %v199_v54 = vpop.xlane.xlu0 %198 }
 0x28a   :  { %1858 = vrsqrt.f32 %v202_v53  ;;  %v201_v55 = vmul.f32 0.03125, %v199_v54 }
 0x28c   :  { %v203_v56 = vadd.f32 1e-12, %v201_v55 }
 0x28e   :  { %1860 = vrsqrt.f32 %v203_v56 }
 0x294   :  { %v1859_v57 = vpop.eup %1858 }
 0x295   :  { %v206_v58 = vmul.f32 %v1859_v57, %v190_v42 }
 0x297   :  { %v212_v61 = vmul.f32 %v211_v38, %v206_v58 }
 0x298   :  { %v1861_v59 = vpop.eup %1860 }
 0x299   :  { %v207_v60 = vmul.f32 %v1861_v59, %v191_v44  ;;  %v2065_v0 = vadd.f32 %v216_v62, %v212_v61 }
 0x29b   :  { %v213_v63 = vmul.f32 %v211_v38, %v207_v60 }
 0x29d   :  { %v2067_v1 = vadd.f32 %v216_v62, %v213_v63 }
 0x29f   :  { %v243_v2 = vpack.c.bf16 %v2067_v1, %v2065_v0 }
 0x2a1   :  { %1689 = vmatmul.mubr.msk.bf16.vlgmr.msra.gmra.mrb[4].mxu0 %vm180_vm15, %v243_v2 }
 0x2a2   :  { %1718 = vmatprep.mubr.msk.bf16.mxu0 %vm1947_vm0, %v1944_v9 }
 0x374   :  { %v297_v5 = vpop.f32.mrb[4].mxu0 }
 0x375   :  { %v1690_v6 = vpop.f32.mrb[5].mxu0  ;;  %v298_v8 = vadd.f32 %v297_v5, %v2078_v4 }
 0x376   :  { %v300_v7 = vpop.f32.mrb[6].mxu0 }
 0x377   :  { %v301_v10 = vadd.f32 %v300_v7, %v2078_v4  ;;  %v1691_v11 = vpop.f32.mrb[7].mxu0 }
 0x379   :  { %v2082_v12 = vpack.c.bf16 %v301_v10, %v298_v8 }
 0x37b   :  { %306 = vrot.lane.b32.xlu0 %v2082_v12, %s1946_s15 }
 0x3ed   :  { %v307_v13 = vpop.permute.xlu0 %306 }
 0x3ee   :  { %v313_v14 = vsel %vm308_vm1, %v307_v13, 0 }
 0x3ef   :  { %1693 = vmatpush3.bf16.xpose.msra.mxu1 %v313_v14 }
 0x3f0   :  { %1698 = vmatprep.subr.bf16.mxu1 %v1944_v9 }
 0x3f6   :  { %1695 = vmatmul.mubr.msk.bf16.vlgmr.msra.gmra.mrb[0].mxu1 %vm308_vm1, %v2082_v12 }
 0x3f7   :  { %1700 = vmatprep.mubr.msk.bf16.mxu1 %vm1947_vm0, %v1944_v9 }
 0x4c9   :  { %v349_v29 = vpop.f32.mrb[0].mxu1 }
 0x4ca   :  { %v356_v32 = vmul.f32 0.25, %v349_v29  ;;  %v1696_v33 = vpop.f32.mrb[1].mxu1 }
 0x4cb   :  { %v352_v36 = vpop.f32.mrb[2].mxu1 }
 0x4cc   :  { %v357_v38 = vmul.f32 0.25, %v352_v36  ;;  %v1697_v39 = vpop.f32.mrb[3].mxu1  ;;  %v358_v40 = vadd.f32 %v356_v32, %v2095_v31 }
 0x4ce   :  { %v360_v41 = vsel %vm308_vm1, %v358_v40, -inf  ;;  %v359_v42 = vadd.f32 %v357_v38, %v2097_v18 }
 0x4cf   :  { %361 = vmax.xlane.f32.xlu1 %v360_v41 }
 0x4d0   :  { %v363_v43 = vsel %vm308_vm1, %v359_v42, -inf }
 0x4d1   :  { %364 = vmax.xlane.f32.xlu0 %v363_v43 }
 0x55c   :  { %v362_v44 = vpop.xlane.xlu1 %361 }
 0x55d   :  { %v366_v45 = vsub.f32 %v358_v40, %v362_v44 }
 0x55e   :  { %v365_v46 = vpop.xlane.xlu0 %364 }
 0x55f   :  { %v368_v47 = vmul.f32 1.442695, %v366_v45  ;;  %v367_v48 = vsub.f32 %v359_v42, %v365_v46 }
 0x561   :  { %1862 = vpow2.f32 %v368_v47  ;;  %v370_v51 = vmul.f32 1.442695, %v367_v48 }
 0x563   :  { %1864 = vpow2.f32 %v370_v51 }
 0x56b   :  { %v1863_v52 = vpop.eup %1862 }
 0x56c   :  { %v372_v53 = vsel %vm308_vm1, %v1863_v52, 0.0 }
 0x56d   :  { %v1865_v54 = vpop.eup %1864  ;;  %373 = vadd.xlane.f32.xlu1 %v372_v53 }
 0x56e   :  { %v375_v55 = vsel %vm308_vm1, %v1865_v54, 0.0 }
 0x56f   :  { %376 = vadd.xlane.f32.xlu0 %v375_v55 }
 0x57e   :  { %383 = vrot.lane.b32.xlu1 %v2082_v12, %s1949_s19 }
 0x582   :  { %431 = vrot.lane.b32.xlu1 %v2082_v12, %s1950_s20 }
 0x585   :  { %433 = vrot.lane.b32.xlu0 %v2082_v12, %s1951_s21 }
 0x5fa   :  { %v374_v56 = vpop.xlane.xlu1 %373 }
 0x5fb   :  { %1866 = vrcp.f32 %v374_v56 }
 0x5fc   :  { %v377_v57 = vpop.xlane.xlu0 %376 }
 0x5fd   :  { %1868 = vrcp.f32 %v377_v57 }
 0x5fe   :  { %v384_v58 = vpop.permute.xlu1 %383 }
 0x5ff   :  { %1699 = vmatpush3.bf16.msra.mxu1 %v384_v58 }
 0x600   :  { %1704 = vmatprep.subr.bf16.mxu1 %v1944_v9  ;;  %v434_v63 = vpop.permute.xlu0 %433 }
 0x601   :  { %v439_v5 = vsel %vm308_vm1, %v434_v63, 0 }
 0x602   :  { %v432_v6 = vpop.permute.xlu1 %431 }
 0x605   :  { %v1867_v59 = vpop.eup %1866 }
 0x606   :  { %v380_v61 = vmul.f32 %v1867_v59, %v1863_v52 }
 0x607   :  { %v1869_v60 = vpop.eup %1868 }
 0x608   :  { %v381_v62 = vmul.f32 %v1869_v60, %v1865_v54 }
 0x60a   :  { %v382_v2 = vpack.c.bf16 %v381_v62, %v380_v61 }
 0x60c   :  { %1701 = vmatmul.mubr.msk.bf16.vlgmr.msra.gmra.mrb[4].mxu1 %vm308_vm1, %v382_v2 }
 0x60d   :  { %1705 = vmatpush3.bf16.xpose.msra.mxu1 %v439_v5  ;;  %1706 = vmatprep.mubr.msk.bf16.mxu1 %vm1947_vm0, %v1944_v9 }
 0x60e   :  { %1710 = vmatprep.subr.bf16.mxu1 %v1944_v9 }
 0x614   :  { %1707 = vmatmul.mubr.msk.bf16.vlgmr.msra.gmra.mrb[8].mxu1 %vm308_vm1, %v432_v6 }
 0x615   :  { %1712 = vmatprep.mubr.msk.bf16.mxu1 %vm1947_vm0, %v1944_v9 }
 0x6df   :  { %v423_v7 = vpop.f32.mrb[4].mxu1 }
 0x6e0   :  { %v1702_v8 = vpop.f32.mrb[5].mxu1 }
 0x6e1   :  { %v426_v10 = vpop.f32.mrb[6].mxu1 }
 0x6e2   :  { %v430_v11 = vpack.c.bf16 %v426_v10, %v423_v7  ;;  %v1703_v13 = vpop.f32.mrb[7].mxu1 }
 0x6e7   :  { %v475_v14 = vpop.f32.mrb[8].mxu1 }
 0x6e8   :  { %v482_v15 = vmul.f32 0.25, %v475_v14  ;;  %v1708_v16 = vpop.f32.mrb[9].mxu1 }
 0x6e9   :  { %v478_v17 = vpop.f32.mrb[10].mxu1 }
 0x6ea   :  { %v483_v19 = vmul.f32 0.25, %v478_v17  ;;  %v1709_v20 = vpop.f32.mrb[11].mxu1  ;;  %v484_v21 = vadd.f32 %v482_v15, %v2095_v31 }
 0x6ec   :  { %v486_v22 = vsel %vm308_vm1, %v484_v21, -inf  ;;  %v485_v23 = vadd.f32 %v483_v19, %v2097_v18 }
 0x6ed   :  { %487 = vmax.xlane.f32.xlu1 %v486_v22  ;;  %v1842_v22 = vld [vmem:[%s2362_s2 + $0x4] ss:$8 sps:$4 sm:$0xff]  }
 0x6ee   :  { %v489_v24 = vsel %vm308_vm1, %v485_v23, -inf }
 0x6ef   :  { %490 = vmax.xlane.f32.xlu0 %v489_v24  ;;  %v700_v24 = vsub.s32 1, %v2032_v34 }
 0x77a   :  { %v488_v25 = vpop.xlane.xlu1 %487 }
 0x77b   :  { %v492_v26 = vsub.f32 %v484_v21, %v488_v25  ;;  %v701_v25 = vrot.slane %v2041_v37, %v700_v24 }
 0x77c   :  { %v491_v27 = vpop.xlane.xlu0 %490 }
 0x77d   :  { %v494_v28 = vmul.f32 1.442695, %v492_v26  ;;  %v493_v29 = vsub.f32 %v485_v23, %v491_v27  ;;  %v1843_v23 = vld [vmem:[%s2362_s2 + $0x14] ss:$8 sps:$4 sm:$0xff]  }
 0x77f   :  { %1870 = vpow2.f32 %v494_v28  ;;  %v496_v30 = vmul.f32 1.442695, %v493_v29 }
 0x781   :  { %1872 = vpow2.f32 %v496_v30 }
 0x789   :  { %v1871_v32 = vpop.eup %1870 }
 0x78a   :  { %v498_v33 = vsel %vm308_vm1, %v1871_v32, 0.0 }
 0x78b   :  { %v1873_v36 = vpop.eup %1872  ;;  %499 = vadd.xlane.f32.xlu0 %v498_v33 }
 0x78c   :  { %v501_v38 = vsel %vm308_vm1, %v1873_v36, 0.0 }
 0x78d   :  { %502 = vadd.xlane.f32.xlu1 %v501_v38 }
 0x79e   :  { %557 = vrot.lane.b32.xlu1 %v2057_v50, %s1952_s22 }
 0x7a1   :  { %509 = vrot.lane.b32.xlu0 %v2082_v12, %s1953_s23 }
 0x7a2   :  { %604 = vrot.lane.b32.xlu1 %v2050_v49, %s1952_s22 }
 0x7a5   :  { %652 = vrot.lane.b32.xlu0 %v2078_v4, %s1952_s22 }
 0x818   :  { %v500_v39 = vpop.xlane.xlu0 %499 }
 0x819   :  { %1874 = vrcp.f32 %v500_v39 }
 0x81a   :  { %v503_v40 = vpop.xlane.xlu1 %502 }
 0x81b   :  { %1876 = vrcp.f32 %v503_v40 }
 0x81c   :  { %v510_v41 = vpop.permute.xlu0 %509 }
 0x81d   :  { %1711 = vmatpush3.bf16.msra.mxu1 %v510_v41 }
 0x81e   :  { %v558_v42 = vpop.permute.xlu1 %557  ;;  %1722 = vmatprep.subr.bf16.mxu1 %v1944_v9 }
 0x81f   :  { %1717 = vmatpush3.bf16.msra.mxu0 %v558_v42 }
 0x820   :  { %1728 = vmatprep.subr.bf16.mxu0 %v1944_v9  ;;  %v653_v57 = vpop.permute.xlu0 %652 }
 0x822   :  { %v605_v45 = vpop.permute.xlu1 %604 }
 0x823   :  { %v1875_v50 = vpop.eup %1874 }
 0x824   :  { %v506_v43 = vmul.f32 %v1875_v50, %v1871_v32 }
 0x825   :  { %v1877_v12 = vpop.eup %1876 }
 0x826   :  { %v507_v44 = vmul.f32 %v1877_v12, %v1873_v36 }
 0x828   :  { %v508_v49 = vpack.c.bf16 %v507_v44, %v506_v43  ;;  %v1844_v43 = vld [vmem:[%s2363_s3] sm:$0xff]   ;;  %v1845_v44 = vld [vmem:[%s2363_s3 + $0x8] sm:$0xff]  }
 0x82a   :  { %1713 = vmatmul.mubr.msk.bf16.vlgmr.msra.gmra.mrb[12].mxu1 %vm308_vm1, %v508_v49  ;;  %v1846_v49 = vld [vmem:[%s2363_s3 + $0x10] sm:$0xff]  }
 0x82b   :  { %1723 = vmatpush3.bf16.msra.mxu1 %v605_v45  ;;  %1724 = vmatprep.mubr.msk.bf16.mxu1 %vm1947_vm0, %v1944_v9  ;;  %v1847_v45 = vld [vmem:[%s2363_s3 + $0x18] sm:$0xff]  }
 0x82c   :  { %1736 = vmatprep.subr.bf16.mxu1 %v1944_v9 }
 0x832   :  { %1725 = vmatmul.mubr.msk.bf16.vlgmr.msra.gmra.mrb[16].mxu1 %vm308_vm1, %v430_v11 }
 0x833   :  { %1744 = vmatprep.mubr.msk.bf16.mxu1 %vm1947_vm0, %v1944_v9  ;;  %1737 = vmatpush3.bf16.msra.mxu1 %v1844_v43 }
 0x834   :  { %1738 = vmatprep.subr.bf16.mxu1 %v1944_v9 }
 0x837   :  { %1739 = vmatpush3.bf16.msra.mxu1 %v1845_v44 }
 0x838   :  { %1740 = vmatprep.subr.bf16.mxu1 %v1944_v9 }
 0x83b   :  { %1741 = vmatpush3.bf16.msra.mxu1 %v1846_v49 }
 0x83c   :  { %1742 = vmatprep.subr.bf16.mxu1 %v1944_v9 }
 0x83f   :  { %1743 = vmatpush3.bf16.msra.mxu1 %v1847_v45 }
 0x840   :  { %1762 = vmatprep.subr.bf16.mxu1 %v1944_v9 }
 0x8fd   :  { %v549_v4 = vpop.f32.mrb[12].mxu1 }
 0x8fe   :  { %v1714_v46 = vpop.f32.mrb[13].mxu1 }
 0x8ff   :  { %v552_v47 = vpop.f32.mrb[14].mxu1 }
 0x900   :  { %v556_v48 = vpack.c.bf16 %v552_v47, %v549_v4  ;;  %v1715_v51 = vpop.f32.mrb[15].mxu1 }
 0x902   :  { %1719 = vmatmul.mubr.msk.bf16.vlgmr.msra.gmra.mrb[8].mxu0 %vm308_vm1, %v556_v48 }
 0x903   :  { %1732 = vmatprep.mubr.msk.bf16.mxu0 %vm1947_vm0, %v1944_v9  ;;  %1729 = vmatpush3.bf16.msra.mxu0 %v1842_v22 }
 0x904   :  { %1730 = vmatprep.subr.bf16.mxu0 %v1944_v9 }
 0x905   :  { %v644_v52 = vpop.f32.mrb[16].mxu1 }
 0x906   :  { %v1726_v53 = vpop.f32.mrb[17].mxu1 }
 0x907   :  { %v647_v54 = vpop.f32.mrb[18].mxu1  ;;  %1731 = vmatpush3.bf16.msra.mxu0 %v1843_v23 }
 0x908   :  { %v1727_v55 = vpop.f32.mrb[19].mxu1  ;;  %1748 = vmatprep.subr.bf16.mxu0 %v1944_v9 }
 0x9d5   :  { %v597_v56 = vpop.f32.mrb[8].mxu0 }
 0x9d6   :  { %v645_v58 = vadd.f32 %v644_v52, %v597_v56  ;;  %v1720_v59 = vpop.f32.mrb[9].mxu0 }
 0x9d7   :  { %v600_v60 = vpop.f32.mrb[10].mxu0 }
 0x9d8   :  { %v655_v61 = vadd.f32 %v653_v57, %v645_v58  ;;  %v648_v62 = vadd.f32 %v647_v54, %v600_v60  ;;  %v1721_v63 = vpop.f32.mrb[11].mxu0 }
 0x9da   :  { %v656_v2 = vadd.f32 %v653_v57, %v648_v62  ;;  %v657_v5 = vadd.f32 %v655_v61, %v2065_v0 }
 0x9dc   :  { %v659_v6 = vsel %vm180_vm15, %v657_v5, 0.0  ;;  %v658_v7 = vadd.f32 %v656_v2, %v2067_v1  ;;  %v687_v1 = vsub.s32 2, %v2032_v34 }
 0x9dd   :  { %660 = vadd.xlane.f32.xlu1 %v659_v6 }
 0x9de   :  { %v662_v8 = vsel %vm180_vm15, %v658_v7, 0.0  ;;  %v2156_v21 = vrot.slane %v2041_v37, %v687_v1 }
 0x9df   :  { %663 = vadd.xlane.f32.xlu0 %v662_v8 }
 0xa6a   :  { %v661_v10 = vpop.xlane.xlu1 %660 }
 0xa6b   :  { %v665_v11 = vmul.f32 0.03125, %v661_v10 }
 0xa6c   :  { %v664_v13 = vpop.xlane.xlu0 %663 }
 0xa6d   :  { %v667_v14 = vsub.f32 %v657_v5, %v665_v11  ;;  %v666_v15 = vmul.f32 0.03125, %v664_v13 }
 0xa6f   :  { %v668_v16 = vsub.f32 %v658_v7, %v666_v15  ;;  %v669_v17 = vmul.f32 %v667_v14, %v667_v14 }
 0xa71   :  { %v671_v19 = vsel %vm180_vm15, %v669_v17, 0.0  ;;  %v670_v20 = vmul.f32 %v668_v16, %v668_v16 }
 0xa72   :  { %672 = vadd.xlane.f32.xlu0 %v671_v19 }
 0xa73   :  { %v674_v0 = vsel %vm180_vm15, %v670_v20, 0.0 }
 0xa74   :  { %675 = vadd.xlane.f32.xlu1 %v674_v0 }
 0xa85   :  { %806 = vrot.lane.b32.xlu1 %v701_v25, %s1949_s19 }
 0xa88   :  { %692 = vrot.lane.b32.xlu0 %v2156_v21, %s1946_s15 }
 0xaff   :  { %v673_v26 = vpop.xlane.xlu0 %672 }
 0xb00   :  { %v677_v27 = vmul.f32 0.03125, %v673_v26 }
 0xb01   :  { %v676_v28 = vpop.xlane.xlu1 %675 }
 0xb02   :  { %v679_v29 = vadd.f32 1e-12, %v677_v27  ;;  %v678_v30 = vmul.f32 0.03125, %v676_v28 }
 0xb03   :  { %v693_v41 = vpop.permute.xlu0 %692 }
 0xb04   :  { %1878 = vrsqrt.f32 %v679_v29  ;;  %v680_v32 = vadd.f32 1e-12, %v678_v30 }
 0xb06   :  { %1880 = vrsqrt.f32 %v680_v32 }
 0xb0e   :  { %v1879_v33 = vpop.eup %1878 }
 0xb0f   :  { %v683_v36 = vmul.f32 %v1879_v33, %v667_v14  ;;  %v807_v14 = vpop.permute.xlu1 %806 }
 0xb10   :  { %v1881_v38 = vpop.eup %1880 }
 0xb11   :  { %v684_v39 = vmul.f32 %v1881_v38, %v668_v16  ;;  %v689_v40 = vmul.f32 %v2156_v21, %v683_v36 }
 0xb13   :  { %v690_v42 = vmul.f32 %v2156_v21, %v684_v39  ;;  %v695_v37 = vadd.f32 %v693_v41, %v689_v40 }
 0xb15   :  { %v696_v50 = vadd.f32 %v693_v41, %v690_v42  ;;  %v2208_v41 = vld [vmem:[%s2362_s2 + $0x20] ss:$8 sps:$4 sm:$0xff]   ;;  %v2215_v42 = vld [vmem:[%s2362_s2 + $0x30] ss:$8 sps:$4 sm:$0xff]  }
 0xb17   :  { %v697_v12 = vpack.c.bf16 %v696_v50, %v695_v37 }
 0xb19   :  { %1733 = vmatmul.mubr.msk.bf16.vlgmr.msra.gmra.mrb[12].mxu0 %vm180_vm15, %v697_v12 }
 0xb1a   :  { %1752 = vmatprep.mubr.msk.bf16.mxu0 %vm1947_vm0, %v1944_v9  ;;  %1749 = vmatpush3.bf16.msra.mxu0 %v2208_v41 }
 0xb1b   :  { %1750 = vmatprep.subr.bf16.mxu0 %v1944_v9 }
 0xb1e   :  { %1751 = vmatpush3.bf16.msra.mxu0 %v2215_v42 }
 0xb1f   :  { %1756 = vmatprep.subr.bf16.mxu0 %v1944_v9 }
 0xbec   :  { %v747_v4 = vpop.f32.mrb[12].mxu0 }
 0xbed   :  { %v748_v46 = vadd.f32 %v747_v4, %v701_v25  ;;  %v1734_v47 = vpop.f32.mrb[13].mxu0 }
 0xbee   :  { %v750_v48 = vpop.f32.mrb[14].mxu0 }
 0xbef   :  { %v756_v51 = vmul.f32 0.044715, %v748_v46  ;;  %v751_v52 = vadd.f32 %v750_v48, %v701_v25  ;;  %v1735_v53 = vpop.f32.mrb[15].mxu0  ;;  %v754_v6 = vmul.f32 0.5, %v748_v46 }
 0xbf1   :  { %v758_v54 = vmul.f32 %v756_v51, %v748_v46  ;;  %v757_v55 = vmul.f32 0.044715, %v751_v52  ;;  %v755_v7 = vmul.f32 0.5, %v751_v52 }
 0xbf3   :  { %v760_v56 = vmul.f32 %v758_v54, %v748_v46  ;;  %v759_v57 = vmul.f32 %v757_v55, %v751_v52 }
 0xbf5   :  { %v762_v58 = vadd.f32 %v760_v56, %v748_v46  ;;  %v761_v59 = vmul.f32 %v759_v57, %v751_v52  ;;  %v2229_v56 = vunpack.c.h.bf16 %v2037_v35 }
 0xbf7   :  { %v764_v60 = vmul.f32 0.7978846, %v762_v58  ;;  %v763_v61 = vadd.f32 %v761_v59, %v751_v52  ;;  %v2234_v57 = vrot.slane %v2229_v56, %v246_v3 }
 0xbf9   :  { %1882 = vtanh.f32 %v764_v60  ;;  %v765_v62 = vmul.f32 0.7978846, %v763_v61 }
 0xbfb   :  { %1884 = vtanh.f32 %v765_v62 }
 0xc03   :  { %v1883_v63 = vpop.eup %1882 }
 0xc04   :  { %v768_v2 = vadd.f32 1.0, %v1883_v63 }
 0xc05   :  { %v1885_v5 = vpop.eup %1884 }
 0xc06   :  { %v769_v8 = vadd.f32 1.0, %v1885_v5  ;;  %v770_v10 = vmul.f32 %v768_v2, %v754_v6 }
 0xc08   :  { %v771_v11 = vmul.f32 %v769_v8, %v755_v7 }
 0xc0a   :  { %v772_v13 = vpack.c.bf16 %v771_v11, %v770_v10 }
 0xc0c   :  { %1745 = vmatmul.mubr.msk.bf16.vlgmr.msra.gmra.mrb[20].mxu1 %vm809_vm4, %v772_v13 }
 0xc0d   :  { %1764 = vmatprep.mubr.msk.bf16.mxu1 %vm1947_vm0, %v1944_v9 }
 0xcdf   :  { %v847_v15 = vpop.f32.mrb[20].mxu1 }
 0xce0   :  { %v848_v16 = vadd.f32 %v847_v15, %v807_v14  ;;  %v1746_v17 = vpop.f32.mrb[21].mxu1 }
 0xce1   :  { %v850_v19 = vpop.f32.mrb[22].mxu1 }
 0xce2   :  { %v851_v20 = vadd.f32 %v850_v19, %v807_v14  ;;  %v1747_v0 = vpop.f32.mrb[23].mxu1  ;;  %v854_v22 = vadd.f32 %v848_v16, %v695_v37 }
 0xce4   :  { %v856_v23 = vsel %vm180_vm15, %v854_v22, 0.0  ;;  %v855_v25 = vadd.f32 %v851_v20, %v696_v50 }
 0xce5   :  { %857 = vadd.xlane.f32.xlu1 %v856_v23 }
 0xce6   :  { %v859_v26 = vsel %vm180_vm15, %v855_v25, 0.0 }
 0xce7   :  { %860 = vadd.xlane.f32.xlu0 %v859_v26 }
 0xd72   :  { %v858_v27 = vpop.xlane.xlu1 %857 }
 0xd73   :  { %v862_v28 = vmul.f32 0.03125, %v858_v27 }
 0xd74   :  { %v861_v29 = vpop.xlane.xlu0 %860 }
 0xd75   :  { %v864_v30 = vsub.f32 %v854_v22, %v862_v28  ;;  %v863_v32 = vmul.f32 0.03125, %v861_v29 }
 0xd77   :  { %v865_v33 = vsub.f32 %v855_v25, %v863_v32  ;;  %v866_v36 = vmul.f32 %v864_v30, %v864_v30 }
 0xd79   :  { %v868_v38 = vsel %vm180_vm15, %v866_v36, 0.0  ;;  %v867_v39 = vmul.f32 %v865_v33, %v865_v33 }
 0xd7a   :  { %869 = vadd.xlane.f32.xlu0 %v868_v38 }
 0xd7b   :  { %v871_v40 = vsel %vm180_vm15, %v867_v39, 0.0 }
 0xd7c   :  { %872 = vadd.xlane.f32.xlu1 %v871_v40 }
 0xd8d   :  { %887 = vrot.lane.b32.xlu1 %v2156_v21, %s1952_s22 }
 0xd90   :  { %882 = vrot.lane.b32.xlu0 %v2156_v21, %s1949_s19 }
 0xe07   :  { %v870_v37 = vpop.xlane.xlu0 %869 }
 0xe08   :  { %v874_v21 = vmul.f32 0.03125, %v870_v37 }
 0xe09   :  { %v873_v50 = vpop.xlane.xlu1 %872 }
 0xe0a   :  { %v876_v12 = vadd.f32 1e-12, %v874_v21  ;;  %v875_v43 = vmul.f32 0.03125, %v873_v50 }
 0xe0b   :  { %v883_v45 = vpop.permute.xlu0 %882 }
 0xe0c   :  { %1886 = vrsqrt.f32 %v876_v12  ;;  %v877_v44 = vadd.f32 1e-12, %v875_v43 }
 0xe0d   :  { %v888_v51 = vpop.permute.xlu1 %887 }
 0xe0e   :  { %1888 = vrsqrt.f32 %v877_v44 }
 0xe16   :  { %v1887_v49 = vpop.eup %1886 }
 0xe17   :  { %v880_v4 = vmul.f32 %v1887_v49, %v864_v30 }
 0xe18   :  { %v1889_v46 = vpop.eup %1888 }
 0xe19   :  { %v881_v47 = vmul.f32 %v1889_v46, %v865_v33  ;;  %v885_v48 = vmul.f32 %v883_v45, %v880_v4 }
 0xe1b   :  { %v886_v52 = vmul.f32 %v883_v45, %v881_v47  ;;  %v2219_v53 = vadd.f32 %v888_v51, %v885_v48 }
 0xe1d   :  { %v2221_v54 = vadd.f32 %v888_v51, %v886_v52 }
 0xe1f   :  { %v897_v55 = vpack.c.bf16 %v2221_v54, %v2219_v53 }
 0xe21   :  { %1753 = vmatmul.mubr.msk.bf16.vlgmr.msra.gmra.mrb[16].mxu0 %vm180_vm15, %v897_v55 }
 0xe22   :  { %1758 = vmatprep.mubr.msk.bf16.mxu0 %vm1947_vm0, %v1944_v9 }
 0xef4   :  { %v951_v58 = vpop.f32.mrb[16].mxu0 }
 0xef5   :  { %v1754_v59 = vpop.f32.mrb[17].mxu0  ;;  %v952_v61 = vadd.f32 %v951_v58, %v2234_v57 }
 0xef6   :  { %v954_v60 = vpop.f32.mrb[18].mxu0 }
 0xef7   :  { %v955_v62 = vadd.f32 %v954_v60, %v2234_v57  ;;  %v1755_v63 = vpop.f32.mrb[19].mxu0 }
 0xef9   :  { %v2238_v2 = vpack.c.bf16 %v955_v62, %v952_v61 }
 0xefb   :  { %1086 = vrot.lane.b32.xlu0 %v2238_v2, %s1951_s21  ;;  %960 = vrot.lane.b32.xlu1 %v2238_v2, %s1946_s15 }
 0xeff   :  { %1084 = vrot.lane.b32.xlu1 %v2238_v2, %s1950_s20 }
 0xf6d   :  { %v961_v35 = vpop.permute.xlu1 %960  ;;  %v1087_v5 = vpop.permute.xlu0 %1086 }
 0xf6e   :  { %v966_v3 = vsel %vm308_vm1, %v961_v35, 0  ;;  %v1092_v6 = vsel %vm308_vm1, %v1087_v5, 0 }
 0xf6f   :  { %1757 = vmatpush3.bf16.xpose.msra.mxu0 %v966_v3 }
 0xf70   :  { %1768 = vmatprep.subr.bf16.mxu0 %v1944_v9 }
 0xf71   :  { %v1085_v7 = vpop.permute.xlu1 %1084 }
 0xf76   :  { %1759 = vmatmul.mubr.msk.bf16.vlgmr.msra.gmra.mrb[20].mxu0 %vm308_vm1, %v2238_v2 }
 0xf77   :  { %1769 = vmatpush3.bf16.xpose.msra.mxu0 %v1092_v6  ;;  %1770 = vmatprep.mubr.msk.bf16.mxu0 %vm1947_vm0, %v1944_v9 }
 0xf78   :  { %1780 = vmatprep.subr.bf16.mxu0 %v1944_v9 }
 0xf7e   :  { %1771 = vmatmul.mubr.msk.bf16.vlgmr.msra.gmra.mrb[24].mxu0 %vm308_vm1, %v1085_v7 }
 0xf7f   :  { %1782 = vmatprep.mubr.msk.bf16.mxu0 %vm1947_vm0, %v1944_v9 }
0x1049   :  { %v1002_v8 = vpop.f32.mrb[20].mxu0 }
0x104a   :  { %v1009_v10 = vmul.f32 0.25, %v1002_v8  ;;  %v1760_v11 = vpop.f32.mrb[21].mxu0 }
0x104b   :  { %v1005_v13 = vpop.f32.mrb[22].mxu0 }
0x104c   :  { %v1010_v14 = vmul.f32 0.25, %v1005_v13  ;;  %v1761_v15 = vpop.f32.mrb[23].mxu0  ;;  %v1011_v16 = vadd.f32 %v1009_v10, %v2095_v31 }
0x104e   :  { %v1013_v17 = vsel %vm308_vm1, %v1011_v16, -inf  ;;  %v1012_v19 = vadd.f32 %v1010_v14, %v2097_v18 }
0x104f   :  { %1014 = vmax.xlane.f32.xlu0 %v1013_v17 }
0x1050   :  { %v1016_v20 = vsel %vm308_vm1, %v1012_v19, -inf }
0x1051   :  { %1017 = vmax.xlane.f32.xlu1 %v1016_v20  ;;  %v1128_v0 = vpop.f32.mrb[24].mxu0 }
0x1052   :  { %v1135_v22 = vmul.f32 0.25, %v1128_v0  ;;  %v1772_v23 = vpop.f32.mrb[25].mxu0 }
0x1053   :  { %v1131_v25 = vpop.f32.mrb[26].mxu0 }
0x1054   :  { %v1136_v26 = vmul.f32 0.25, %v1131_v25  ;;  %v1773_v27 = vpop.f32.mrb[27].mxu0  ;;  %v1137_v28 = vadd.f32 %v1135_v22, %v2095_v31 }
0x1056   :  { %v1139_v29 = vsel %vm308_vm1, %v1137_v28, -inf  ;;  %v1138_v30 = vadd.f32 %v1136_v26, %v2097_v18 }
0x1057   :  { %1140 = vmax.xlane.f32.xlu0 %v1139_v29 }
0x1058   :  { %v1142_v32 = vsel %vm308_vm1, %v1138_v30, -inf }
0x105b   :  { %1143 = vmax.xlane.f32.xlu0 %v1142_v32 }
0x10dc   :  { %v1015_v33 = vpop.xlane.xlu0 %1014 }
0x10dd   :  { %v1019_v36 = vsub.f32 %v1011_v16, %v1015_v33 }
0x10de   :  { %v1018_v38 = vpop.xlane.xlu1 %1017 }
0x10df   :  { %v1021_v39 = vmul.f32 1.442695, %v1019_v36  ;;  %v1020_v40 = vsub.f32 %v1012_v19, %v1018_v38 }
0x10e1   :  { %1890 = vpow2.f32 %v1021_v39  ;;  %v1023_v37 = vmul.f32 1.442695, %v1020_v40 }
0x10e3   :  { %1892 = vpow2.f32 %v1023_v37 }
0x10e4   :  { %v1141_v21 = vpop.xlane.xlu0 %1140 }
0x10e5   :  { %v1145_v50 = vsub.f32 %v1137_v28, %v1141_v21 }
0x10e7   :  { %v1147_v12 = vmul.f32 1.442695, %v1145_v50 }
0x10e8   :  { %v1144_v31 = vpop.xlane.xlu0 %1143 }
0x10e9   :  { %1894 = vpow2.f32 %v1147_v12  ;;  %v1146_v43 = vsub.f32 %v1138_v30, %v1144_v31 }
0x10eb   :  { %v1891_v44 = vpop.eup %1890  ;;  %v1149_v18 = vmul.f32 1.442695, %v1146_v43 }
0x10ec   :  { %v1025_v49 = vsel %vm308_vm1, %v1891_v44, 0.0 }
0x10ed   :  { %v1893_v45 = vpop.eup %1892  ;;  %1896 = vpow2.f32 %v1149_v18  ;;  %1026 = vadd.xlane.f32.xlu1 %v1025_v49 }
0x10ee   :  { %v1028_v4 = vsel %vm308_vm1, %v1893_v45, 0.0 }
0x10ef   :  { %1029 = vadd.xlane.f32.xlu0 %v1028_v4 }
0x10f3   :  { %v1895_v46 = vpop.eup %1894 }
0x10f4   :  { %v1151_v47 = vsel %vm308_vm1, %v1895_v46, 0.0 }
0x10f5   :  { %1152 = vadd.xlane.f32.xlu1 %v1151_v47  ;;  %v1852_v47 = vld [vmem:[%s2362_s2 + $0x24] ss:$8 sps:$4 sm:$0xff]  }
0x10f7   :  { %v1897_v48 = vpop.eup %1896 }
0x10f8   :  { %v1154_v51 = vsel %vm308_vm1, %v1897_v48, 0.0 }
0x10f9   :  { %1155 = vadd.xlane.f32.xlu0 %v1154_v51 }
0x1106   :  { %1036 = vrot.lane.b32.xlu1 %v2238_v2, %s1949_s19 }
0x110a   :  { %1210 = vrot.lane.b32.xlu1 %v2215_v42, %s1952_s22 }
0x110e   :  { %1257 = vrot.lane.b32.xlu1 %v2208_v41, %s1952_s22 }
0x110f   :  { %1162 = vrot.lane.b32.xlu0 %v2238_v2, %s1953_s23 }
0x1113   :  { %1305 = vrot.lane.b32.xlu0 %v2234_v57, %s1952_s22 }
0x117a   :  { %v1027_v52 = vpop.xlane.xlu1 %1026 }
0x117b   :  { %1898 = vrcp.f32 %v1027_v52 }
0x117c   :  { %v1030_v55 = vpop.xlane.xlu0 %1029 }
0x117d   :  { %1900 = vrcp.f32 %v1030_v55 }
0x1182   :  { %v1153_v58 = vpop.xlane.xlu1 %1152 }
0x1183   :  { %1902 = vrcp.f32 %v1153_v58 }
0x1185   :  { %v1899_v59 = vpop.eup %1898 }
0x1186   :  { %v1037_v60 = vpop.permute.xlu1 %1036  ;;  %v1156_v61 = vpop.xlane.xlu0 %1155  ;;  %v1033_v42 = vmul.f32 %v1899_v59, %v1891_v44 }
0x1187   :  { %v1901_v62 = vpop.eup %1900  ;;  %1904 = vrcp.f32 %v1156_v61  ;;  %1763 = vmatpush3.bf16.msra.mxu1 %v1037_v60 }
0x1188   :  { %v1034_v41 = vmul.f32 %v1901_v62, %v1893_v45  ;;  %1774 = vmatprep.subr.bf16.mxu1 %v1944_v9 }
0x118a   :  { %v1163_v63 = vpop.permute.xlu0 %1162  ;;  %v1035_v2 = vpack.c.bf16 %v1034_v41, %v1033_v42  ;;  %v1211_v35 = vpop.permute.xlu1 %1210 }
0x118b   :  { %1781 = vmatpush3.bf16.msra.mxu0 %v1211_v35 }
0x118c   :  { %1765 = vmatmul.mubr.msk.bf16.vlgmr.msra.gmra.mrb[24].mxu1 %vm308_vm1, %v1035_v2  ;;  %1792 = vmatprep.subr.bf16.mxu0 %v1944_v9 }
0x118d   :  { %1775 = vmatpush3.bf16.msra.mxu1 %v1163_v63  ;;  %1776 = vmatprep.mubr.msk.bf16.mxu1 %vm1947_vm0, %v1944_v9  ;;  %v1903_v57 = vpop.eup %1902 }
0x118e   :  { %1786 = vmatprep.subr.bf16.mxu1 %v1944_v9  ;;  %v1159_v5 = vmul.f32 %v1903_v57, %v1895_v46  ;;  %v1258_v8 = vpop.permute.xlu1 %1257  ;;  %v1306_v28 = vpop.permute.xlu0 %1305  ;;  %v1854_v57 = vld [vmem:[%s2363_s3 + $0x20] sm:$0xff]  }
0x1191   :  { %v1905_v3 = vpop.eup %1904 }
0x1192   :  { %v1160_v6 = vmul.f32 %v1905_v3, %v1897_v48  ;;  %v1853_v48 = vld [vmem:[%s2362_s2 + $0x34] ss:$8 sps:$4 sm:$0xff]   ;;  %v1855_v3 = vld [vmem:[%s2363_s3 + $0x28] sm:$0xff]  }
0x1194   :  { %v1161_v7 = vpack.c.bf16 %v1160_v6, %v1159_v5  ;;  %v1856_v5 = vld [vmem:[%s2363_s3 + $0x30] sm:$0xff]   ;;  %v1857_v6 = vld [vmem:[%s2363_s3 + $0x38] sm:$0xff]   ;;  %s1954_s3 = smov [#allocation2]  }
0x1196   :  { %1777 = vmatmul.mubr.msk.bf16.vlgmr.msra.gmra.mrb[28].mxu1 %vm308_vm1, %v1161_v7 }
0x1197   :  { %1788 = vmatprep.mubr.msk.bf16.mxu1 %vm1947_vm0, %v1944_v9  ;;  %1787 = vmatpush3.bf16.msra.mxu1 %v1258_v8 }
0x1198   :  { %1800 = vmatprep.subr.bf16.mxu1 %v1944_v9 }
0x125f   :  { %v1076_v10 = vpop.f32.mrb[24].mxu1 }
0x1260   :  { %v1766_v11 = vpop.f32.mrb[25].mxu1 }
0x1261   :  { %v1079_v13 = vpop.f32.mrb[26].mxu1 }
0x1262   :  { %v1083_v14 = vpack.c.bf16 %v1079_v13, %v1076_v10  ;;  %v1767_v15 = vpop.f32.mrb[27].mxu1 }
0x1264   :  { %1789 = vmatmul.mubr.msk.bf16.vlgmr.msra.gmra.mrb[32].mxu1 %vm308_vm1, %v1083_v14 }
0x1265   :  { %1808 = vmatprep.mubr.msk.bf16.mxu1 %vm1947_vm0, %v1944_v9  ;;  %1801 = vmatpush3.bf16.msra.mxu1 %v1854_v57 }
0x1266   :  { %1802 = vmatprep.subr.bf16.mxu1 %v1944_v9 }
0x1269   :  { %v1202_v16 = vpop.f32.mrb[28].mxu1  ;;  %1803 = vmatpush3.bf16.msra.mxu1 %v1855_v3 }
0x126a   :  { %v1778_v17 = vpop.f32.mrb[29].mxu1  ;;  %1804 = vmatprep.subr.bf16.mxu1 %v1944_v9 }
0x126b   :  { %v1205_v19 = vpop.f32.mrb[30].mxu1 }
0x126c   :  { %v1209_v20 = vpack.c.bf16 %v1205_v19, %v1202_v16  ;;  %v1779_v0 = vpop.f32.mrb[31].mxu1 }
0x126d   :  { %1805 = vmatpush3.bf16.msra.mxu1 %v1856_v5 }
0x126e   :  { %1783 = vmatmul.mubr.msk.bf16.vlgmr.msra.gmra.mrb[28].mxu0 %vm308_vm1, %v1209_v20  ;;  %1806 = vmatprep.subr.bf16.mxu1 %v1944_v9 }
0x126f   :  { %1796 = vmatprep.mubr.msk.bf16.mxu0 %vm1947_vm0, %v1944_v9  ;;  %1793 = vmatpush3.bf16.msra.mxu0 %v1852_v47 }
0x1270   :  { %1794 = vmatprep.subr.bf16.mxu0 %v1944_v9 }
0x1271   :  { %1807 = vmatpush3.bf16.msra.mxu1 %v1857_v6 }
0x1273   :  { %1795 = vmatpush3.bf16.msra.mxu0 %v1853_v48 }
0x1337   :  { %v1297_v22 = vpop.f32.mrb[32].mxu1 }
0x1338   :  { %v1790_v23 = vpop.f32.mrb[33].mxu1 }
0x1339   :  { %v1300_v25 = vpop.f32.mrb[34].mxu1 }
0x133a   :  { %v1791_v26 = vpop.f32.mrb[35].mxu1 }
0x1341   :  { %v1250_v27 = vpop.f32.mrb[28].mxu0 }
0x1342   :  { %v1298_v29 = vadd.f32 %v1297_v22, %v1250_v27  ;;  %v1784_v30 = vpop.f32.mrb[29].mxu0 }
0x1343   :  { %v1253_v32 = vpop.f32.mrb[30].mxu0 }
0x1344   :  { %v1308_v33 = vadd.f32 %v1306_v28, %v1298_v29  ;;  %v1301_v36 = vadd.f32 %v1300_v25, %v1253_v32  ;;  %v1785_v38 = vpop.f32.mrb[31].mxu0 }
0x1346   :  { %v1309_v39 = vadd.f32 %v1306_v28, %v1301_v36  ;;  %v1310_v40 = vadd.f32 %v1308_v33, %v2219_v53 }
0x1348   :  { %v1312_v37 = vsel %vm180_vm15, %v1310_v40, 0.0  ;;  %v1311_v21 = vadd.f32 %v1309_v39, %v2221_v54  ;;  %v2304_v54 = vrot.slane %v2229_v56, %v687_v1  ;;  %v1354_v1 = vrot.slane %v2229_v56, %v700_v24 }
0x1349   :  { %1313 = vadd.xlane.f32.xlu1 %v1312_v37 }
0x134a   :  { %v1315_v50 = vsel %vm180_vm15, %v1311_v21, 0.0 }
0x134b   :  { %1316 = vadd.xlane.f32.xlu0 %v1315_v50 }
0x13d6   :  { %v1314_v12 = vpop.xlane.xlu1 %1313 }
0x13d7   :  { %v1318_v31 = vmul.f32 0.03125, %v1314_v12 }
0x13d8   :  { %v1317_v43 = vpop.xlane.xlu0 %1316 }
0x13d9   :  { %v1320_v44 = vsub.f32 %v1310_v40, %v1318_v31  ;;  %v1319_v18 = vmul.f32 0.03125, %v1317_v43 }
0x13db   :  { %v1321_v49 = vsub.f32 %v1311_v21, %v1319_v18  ;;  %v1322_v45 = vmul.f32 %v1320_v44, %v1320_v44 }
0x13dd   :  { %v1324_v4 = vsel %vm180_vm15, %v1322_v45, 0.0  ;;  %v1323_v46 = vmul.f32 %v1321_v49, %v1321_v49 }
0x13de   :  { %1325 = vadd.xlane.f32.xlu0 %v1324_v4 }
0x13df   :  { %v1327_v53 = vsel %vm180_vm15, %v1323_v46, 0.0 }
0x13e0   :  { %1328 = vadd.xlane.f32.xlu1 %v1327_v53 }
0x13f1   :  { %1460 = vrot.lane.b32.xlu1 %v1354_v1, %s1949_s19 }
0x13f4   :  { %1345 = vrot.lane.b32.xlu0 %v2304_v54, %s1946_s15 }
0x146b   :  { %v1326_v51 = vpop.xlane.xlu0 %1325 }
0x146c   :  { %v1330_v52 = vmul.f32 0.03125, %v1326_v51 }
0x146d   :  { %v1329_v55 = vpop.xlane.xlu1 %1328 }
0x146e   :  { %v1332_v58 = vadd.f32 1e-12, %v1330_v52  ;;  %v1331_v59 = vmul.f32 0.03125, %v1329_v55 }
0x146f   :  { %v1346_v2 = vpop.permute.xlu0 %1345 }
0x1470   :  { %1906 = vrsqrt.f32 %v1332_v58  ;;  %v1333_v60 = vadd.f32 1e-12, %v1331_v59 }
0x1471   :  { %v1461_v39 = vpop.permute.xlu1 %1460 }
0x1472   :  { %1908 = vrsqrt.f32 %v1333_v60 }
0x147a   :  { %v1907_v61 = vpop.eup %1906 }
0x147b   :  { %v1336_v62 = vmul.f32 %v1907_v61, %v1320_v44 }
0x147c   :  { %v1909_v42 = vpop.eup %1908 }
0x147d   :  { %v1337_v41 = vmul.f32 %v1909_v42, %v1321_v49  ;;  %v1342_v63 = vmul.f32 %v2304_v54, %v1336_v62 }
0x147f   :  { %v1343_v34 = vmul.f32 %v2304_v54, %v1337_v41  ;;  %v1348_v24 = vadd.f32 %v1346_v2, %v1342_v63 }
0x1481   :  { %v1349_v56 = vadd.f32 %v1346_v2, %v1343_v34 }
0x1483   :  { %v1350_v35 = vpack.c.bf16 %v1349_v56, %v1348_v24 }
0x1485   :  { %1797 = vmatmul.mubr.msk.bf16.vlgmr.msra.gmra.mrb[32].mxu0 %vm180_vm15, %v1350_v35 }
0x1558   :  { %v1400_v7 = vpop.f32.mrb[32].mxu0 }
0x1559   :  { %v1401_v8 = vadd.f32 %v1400_v7, %v1354_v1  ;;  %v1798_v10 = vpop.f32.mrb[33].mxu0 }
0x155a   :  { %v1403_v11 = vpop.f32.mrb[34].mxu0 }
0x155b   :  { %v1409_v13 = vmul.f32 0.044715, %v1401_v8  ;;  %v1404_v14 = vadd.f32 %v1403_v11, %v1354_v1  ;;  %v1799_v15 = vpop.f32.mrb[35].mxu0  ;;  %v1407_v29 = vmul.f32 0.5, %v1401_v8 }
0x155d   :  { %v1411_v16 = vmul.f32 %v1409_v13, %v1401_v8  ;;  %v1410_v17 = vmul.f32 0.044715, %v1404_v14  ;;  %v1408_v30 = vmul.f32 0.5, %v1404_v14 }
0x155f   :  { %v1413_v19 = vmul.f32 %v1411_v16, %v1401_v8  ;;  %v1412_v20 = vmul.f32 %v1410_v17, %v1404_v14 }
0x1561   :  { %v1415_v0 = vadd.f32 %v1413_v19, %v1401_v8  ;;  %v1414_v22 = vmul.f32 %v1412_v20, %v1404_v14 }
0x1563   :  { %v1417_v23 = vmul.f32 0.7978846, %v1415_v0  ;;  %v1416_v25 = vadd.f32 %v1414_v22, %v1404_v14 }
0x1565   :  { %1910 = vtanh.f32 %v1417_v23  ;;  %v1418_v26 = vmul.f32 0.7978846, %v1416_v25 }
0x1567   :  { %1912 = vtanh.f32 %v1418_v26 }
0x156f   :  { %v1911_v9 = vpop.eup %1910 }
0x1570   :  { %v1421_v27 = vadd.f32 1.0, %v1911_v9 }
0x1571   :  { %v1913_v28 = vpop.eup %1912 }
0x1572   :  { %v1422_v32 = vadd.f32 1.0, %v1913_v28  ;;  %v1423_v33 = vmul.f32 %v1421_v27, %v1407_v29 }
0x1574   :  { %v1424_v36 = vmul.f32 %v1422_v32, %v1408_v30 }
0x1576   :  { %v1425_v38 = vpack.c.bf16 %v1424_v36, %v1423_v33 }
0x1578   :  { %1809 = vmatmul.mubr.msk.bf16.vlgmr.msra.gmra.mrb[36].mxu1 %vm809_vm4, %v1425_v38 }
0x164b   :  { %v1500_v40 = vpop.f32.mrb[36].mxu1 }
0x164c   :  { %v1501_v37 = vadd.f32 %v1500_v40, %v1461_v39  ;;  %v1810_v21 = vpop.f32.mrb[37].mxu1 }
0x164d   :  { %v1503_v50 = vpop.f32.mrb[38].mxu1 }
0x164e   :  { %v1504_v12 = vadd.f32 %v1503_v50, %v1461_v39  ;;  %v1811_v31 = vpop.f32.mrb[39].mxu1  ;;  %v1507_v43 = vadd.f32 %v1501_v37, %v1348_v24 }
0x1650   :  { %v1509_v44 = vsel %vm180_vm15, %v1507_v43, 0.0  ;;  %v1508_v18 = vadd.f32 %v1504_v12, %v1349_v56 }
0x1651   :  { %1510 = vadd.xlane.f32.xlu1 %v1509_v44 }
0x1652   :  { %v1512_v49 = vsel %vm180_vm15, %v1508_v18, 0.0 }
0x1653   :  { %1513 = vadd.xlane.f32.xlu0 %v1512_v49 }
0x16de   :  { %v1511_v45 = vpop.xlane.xlu1 %1510 }
0x16df   :  { %v1515_v4 = vmul.f32 0.03125, %v1511_v45 }
0x16e0   :  { %v1514_v46 = vpop.xlane.xlu0 %1513 }
0x16e1   :  { %v1517_v53 = vsub.f32 %v1507_v43, %v1515_v4  ;;  %v1516_v47 = vmul.f32 0.03125, %v1514_v46 }
0x16e3   :  { %v1518_v48 = vsub.f32 %v1508_v18, %v1516_v47  ;;  %v1519_v1 = vmul.f32 %v1517_v53, %v1517_v53 }
0x16e5   :  { %v1521_v51 = vsel %vm180_vm15, %v1519_v1, 0.0  ;;  %v1520_v52 = vmul.f32 %v1518_v48, %v1518_v48 }
0x16e6   :  { %1522 = vadd.xlane.f32.xlu0 %v1521_v51 }
0x16e7   :  { %v1524_v55 = vsel %vm180_vm15, %v1520_v52, 0.0 }
0x16e8   :  { %1525 = vadd.xlane.f32.xlu1 %v1524_v55 }
0x16f9   :  { %1540 = vrot.lane.b32.xlu1 %v2304_v54, %s1952_s22  ;;  %s1561_s22 = sshll.u32 %s1954_s3, 4  ;;  %s1562_s22 = int_to_ptr.vmem [resolvable:$true] %s1561_s22 }
0x16fa   :  { %s1918_s25 = scalar_lea.vmem %s1562_s22, 128  ;;  %p1923_p1 = scmp.lt.s32.totalorder %s1562_s22, %s1562_s22 }
0x16fb   :  { %p1919_p0 = scmp.ne.s32.totalorder %s1562_s22, %s1918_s25  ;;  %p1924_p2 = scmp.lt.s32.totalorder %s1918_s25, %s1918_s25 }
0x16fc   :  { %1535 = vrot.lane.b32.xlu0 %v2304_v54, %s1949_s19 }
0x16fd   :  { %p1925_p3 = por %p1924_p2, %p1923_p1 }
0x16ff   :  { %p1926_p4 = pnand %p1925_p3, %p1919_p0 }
0x1773   :  { %v1523_v58 = vpop.xlane.xlu0 %1522 }
0x1774   :  { %v1527_v59 = vmul.f32 0.03125, %v1523_v58 }
0x1775   :  { %v1526_v60 = vpop.xlane.xlu1 %1525 }
0x1776   :  { %v1529_v61 = vadd.f32 1e-12, %v1527_v59  ;;  %v1528_v62 = vmul.f32 0.03125, %v1526_v60 }
0x1777   :  { %v1536_v63 = vpop.permute.xlu0 %1535 }
0x1778   :  { %1914 = vrsqrt.f32 %v1529_v61  ;;  %v1530_v42 = vadd.f32 1e-12, %v1528_v62 }
0x1779   :  { %v1541_v24 = vpop.permute.xlu1 %1540 }
0x177a   :  { %1916 = vrsqrt.f32 %v1530_v42 }
0x1782   :  { %v1915_v41 = vpop.eup %1914 }
0x1783   :  { %v1533_v2 = vmul.f32 %v1915_v41, %v1517_v53 }
0x1784   :  { %v1917_v34 = vpop.eup %1916 }
0x1785   :  { %v1534_v56 = vmul.f32 %v1917_v34, %v1518_v48  ;;  %v1538_v35 = vmul.f32 %v1536_v63, %v1533_v2 }
0x1787   :  { %v1539_v57 = vmul.f32 %v1536_v63, %v1534_v56  ;;  %v1543_v3 = vadd.f32 %v1541_v24, %v1538_v35 }
0x1789   :  { %v1544_v54 = vadd.f32 %v1541_v24, %v1539_v57  ;;  %v1632_v5 = vpack.c.bf16 %v1543_v3, %v1543_v3 }
0x178b   :  { %v1633_v6 = vpack.c.bf16 %v1544_v54, %v1544_v54  ;;  %1554 = vst.msk [vmem:[#allocation2] sm:$0xf] %vm1553_vm5, %v1632_v5 }
0x178d   :  { %1555 = vst.msk [vmem:[#allocation2 + $0x4] sm:$0xf] %vm1553_vm5, %v1633_v6 }
0x178e   :  { %1929 = shalt.err (!%p1926_p4)
}
0x178f   :  { %s1930_s27 = scalar_lea.hbm %s2365_s5, 128 }
0x1790   :  { %p1931_p5 = scmp.ne.s32.totalorder %s2365_s5, %s1930_s27  ;;  %p1934_p6 = scmp.lt.u32.totalorder %s1930_s27, %s2365_s5 }
0x1792   :  { %p1936_p7 = pnand %p1934_p6, %p1931_p5 }
0x1794   :  { %1939 = shalt.err (!%p1936_p7)
}
0x1795   :  { %s1955_s7 = smov 4  }
0x1796   :  { %1567 = dma.vmem_to_hbm [thread:$0]  %s1562_s22, 128, %s2365_s5, [#allocation3], %s1949_s19, %s1949_s19, %s1955_s7  }
0x1797   :  { %1940 = dma.done.wait [#allocation3], 128  }
0x1798   :  { %1941 = vsyncadd [#allocation3], 4294967168 }
0x1799   :  { %1571 = vsyncpa [#allocation3], 1 }

</bundles_post_ra>
